<compile_context>
chip_gen: v7x
topology: tpu7x:2x2x1
jax: 0.10.0
libtpu: 0.0.40
codegen_flags: <defaults>
</compile_context>

<pallas_src>
import jax
import jax.numpy as jnp
from jax.experimental import pallas as pl
from jax.experimental.pallas import tpu as pltpu

EPS = 1e-12  # F.normalize default eps


def _round_up(x, m):
    return (x + m - 1) // m * m


def _maybe_pad2d(x, rows, cols):
    """Pad only if needed (skips an HBM read+write copy when already aligned)."""
    if x.shape[0] == rows and x.shape[1] == cols:
        return x
    return jnp.pad(x, ((0, rows - x.shape[0]), (0, cols - x.shape[1])))


def _l2_normalize_rows(x):
    # x * rsqrt(max(||x||^2, eps^2)) == x / max(||x||, eps)  (torch F.normalize)
    ss = jnp.sum(x * x, axis=1, keepdims=True)
    inv = jax.lax.rsqrt(jnp.maximum(ss, EPS * EPS))
    return x * inv


def _choose_tile(B, sub):
    """Batch tile TB and padded batch B_p.

    Large B: big tiles (256-512 rows) so resident weights are amortized over
    many LHS rows and the ~0.35us per-grid-step overhead is paid rarely.
    Small/medium B: split into (at least) two tiles so the "parallel" batch
    axis can shard across both TensorCores on v7x; never below one sublane
    group (8 rows f32 / 16 rows bf16).
    """
    if B >= 2 * 512:
        TB = 512
    elif B >= 2 * 256:
        TB = 256
    else:
        TB = max(sub, _round_up(pl.cdiv(B, 2), sub))
    B_p = _round_up(B, TB)
    return TB, B_p


def two_embedding_sum_kernel(
    x_large_ref, x_small_ref,
    w_dec_ref, b_dec_ref,          # (DL_p, S_p), (1, S_p)
    w_sm_ref, b_sm_ref,            # (S_p, S_p),  (1, S_p)
    w1_ref, b1_ref,                # (S_p, 1024), (1, 1024)
    w2_ref, b2_ref,                # (1024, 256), (1, 256)
    w3_ref, b3_ref,                # (256, C_p),  (1, C_p)
    out_ref,                       # (TB, C_p)
):
    # Matmul operand dtype (f32 or bf16); accumulation is always f32 and all
    # elementwise math (bias add, L2-normalize, ReLU) stays f32.
    cdt = w1_ref.dtype

    # embedding projections + per-row L2 normalization
    a = jnp.dot(x_large_ref[...], w_dec_ref[...],
                preferred_element_type=jnp.float32) + b_dec_ref[...]
    a = _l2_normalize_rows(a)

    b = jnp.dot(x_small_ref[...], w_sm_ref[...],
                preferred_element_type=jnp.float32) + b_sm_ref[...]
    b = _l2_normalize_rows(b)

    x_sum = a + b

    # fusion_fc: Linear -> ReLU -> (Dropout: identity at inference)
    #            Linear -> ReLU -> (Dropout: identity) -> Linear
    h1 = jnp.dot(x_sum.astype(cdt), w1_ref[...],
                 preferred_element_type=jnp.float32) + b1_ref[...]
    h1 = jnp.maximum(h1, 0.0)
    h2 = jnp.dot(h1.astype(cdt), w2_ref[...],
                 preferred_element_type=jnp.float32) + b2_ref[...]
    h2 = jnp.maximum(h2, 0.0)
    out = jnp.dot(h2.astype(cdt), w3_ref[...],
                  preferred_element_type=jnp.float32) + b3_ref[...]

    out_ref[...] = out.astype(out_ref.dtype)


def init_params(key, embed_dim1, embed_dim2, num_classes):
    """Deterministic synthetic parameters (PyTorch Linear shapes, pre-transposed)."""
    smaller = min(embed_dim1, embed_dim2)
    larger = max(embed_dim1, embed_dim2)

    def linear(key, d_in, d_out):
        kw, kb = jax.random.split(key)
        bound = 1.0 / jnp.sqrt(d_in)
        # stored as (d_in, d_out) == W.T, bias as (1, d_out)
        w = jax.random.uniform(kw, (d_in, d_out), jnp.float32, -bound, bound)
        b = jax.random.uniform(kb, (1, d_out), jnp.float32, -bound, bound)
        return w, b

    keys = jax.random.split(key, 5)
    params = {}
    params["decrease"] = linear(keys[0], larger, smaller)   # nn.Linear(larger, smaller)
    params["smaller"] = linear(keys[1], smaller, smaller)   # nn.Linear(smaller, smaller)
    params["fc1"] = linear(keys[2], smaller, 1024)          # nn.Linear(smaller, 1024)
    params["fc2"] = linear(keys[3], 1024, 256)              # nn.Linear(1024, 256)
    params["fc3"] = linear(keys[4], 256, num_classes)       # nn.Linear(256, num_classes)
    return params


def two_embedding_sum_forward(x1, x2, params, num_classes, *, use_bf16=False):
    # Static branch (shapes known at trace time): route the larger-dim input
    # through decrease_embed, the smaller-dim one through smaller_embed.
    if x1.shape[1] > x2.shape[1]:
        x_large, x_small = x1, x2
    else:
        x_large, x_small = x2, x1

    B = x1.shape[0]
    C = num_classes
    D_large = x_large.shape[1]
    S = x_small.shape[1]

    w_dec, b_dec = params["decrease"]
    w_sm, b_sm = params["smaller"]
    w1, b1 = params["fc1"]
    w2, b2 = params["fc2"]
    w3, b3 = params["fc3"]
    H1 = w1.shape[1]   # 1024
    H2 = w2.shape[1]   # 256

    # Lane padding to multiples of 128 (zero-filled -> numerically identical;
    # padded a/b lanes are exactly 0, so the L2 sum-of-squares is unchanged).
    DL_p = _round_up(D_large, 128)
    S_p = _round_up(S, 128)
    H1_p = _round_up(H1, 128)
    H2_p = _round_up(H2, 128)
    C_p = _round_up(C, 128)

    # Matmul operand dtype; biases stay f32 (cheap elementwise adds).
    cdt = jnp.bfloat16 if use_bf16 else jnp.float32
    w_itemsize = 2 if use_bf16 else 4
    sub = 16 if use_bf16 else 8          # sublane packing: bf16 packs 16 rows/vreg

    TB, B_p = _choose_tile(B, sub)
    grid = (B_p // TB,)

    # Activations: pad only when necessary, then cast to matmul dtype.
    x_large_p = _maybe_pad2d(x_large, B_p, DL_p).astype(cdt)
    x_small_p = _maybe_pad2d(x_small, B_p, S_p).astype(cdt)

    # Weights: pad (only if needed) and cast; biases stay f32.
    w_dec_p = _maybe_pad2d(w_dec, DL_p, S_p).astype(cdt)
    b_dec_p = _maybe_pad2d(b_dec, 1, S_p)
    w_sm_p = _maybe_pad2d(w_sm, S_p, S_p).astype(cdt)
    b_sm_p = _maybe_pad2d(b_sm, 1, S_p)
    w1_p = _maybe_pad2d(w1, S_p, H1_p).astype(cdt)
    b1_p = _maybe_pad2d(b1, 1, H1_p)
    w2_p = _maybe_pad2d(w2, H1_p, H2_p).astype(cdt)
    b2_p = _maybe_pad2d(b2, 1, H2_p)
    w3_p = _maybe_pad2d(w3, H2_p, C_p).astype(cdt)
    b3_p = _maybe_pad2d(b3, 1, C_p)

    def batch_map(i):
        return (i, 0)

    def const_map(i):
        return (0, 0)

    # Constant-index operands: single-buffered (they never change across grid
    # steps, so double-buffering would only duplicate them in VMEM).
    resident = pl.Buffered(1)

    in_specs = [
        pl.BlockSpec((TB, DL_p), batch_map),                              # x_large tile
        pl.BlockSpec((TB, S_p), batch_map),                               # x_small tile
        pl.BlockSpec((DL_p, S_p), const_map, pipeline_mode=resident),     # w_dec (resident)
        pl.BlockSpec((1, S_p), const_map, pipeline_mode=resident),        # b_dec
        pl.BlockSpec((S_p, S_p), const_map, pipeline_mode=resident),      # w_sm
        pl.BlockSpec((1, S_p), const_map, pipeline_mode=resident),        # b_sm
        pl.BlockSpec((S_p, H1_p), const_map, pipeline_mode=resident),     # w1
        pl.BlockSpec((1, H1_p), const_map, pipeline_mode=resident),       # b1
        pl.BlockSpec((H1_p, H2_p), const_map, pipeline_mode=resident),    # w2
        pl.BlockSpec((1, H2_p), const_map, pipeline_mode=resident),       # b2
        pl.BlockSpec((H2_p, C_p), const_map, pipeline_mode=resident),     # w3
        pl.BlockSpec((1, C_p), const_map, pipeline_mode=resident),        # b3
    ]
    out_specs = pl.BlockSpec((TB, C_p), batch_map)

    # Explicit per-step VMEM budget -> vmem_limit_bytes.
    w_elems = DL_p * S_p + S_p * S_p + S_p * H1_p + H1_p * H2_p + H2_p * C_p
    b_elems = 2 * S_p + H1_p + H2_p + C_p
    weight_vmem = w_itemsize * w_elems + 4 * b_elems                  # single-buffered
    io_vmem = 2 * (w_itemsize * TB * (DL_p + S_p) + 4 * TB * C_p)      # double-buffered tiles
    interm_vmem = 4 * TB * (3 * S_p + H1_p + H2_p + C_p)               # a, b, x_sum, h1, h2, out (f32)
    vmem_est = weight_vmem + io_vmem + interm_vmem
    vmem_limit = int(min(max(int(vmem_est * 1.5) + (4 << 20), 32 << 20), 48 << 20))

    flops = 2 * B_p * w_elems
    weight_bytes = w_itemsize * w_elems + 4 * b_elems
    act_bytes = w_itemsize * B_p * (DL_p + S_p) + 4 * B_p * C_p
    cost = pl.CostEstimate(flops=flops,
                           transcendentals=2 * B_p,
                           bytes_accessed=weight_bytes + act_bytes)

    out_p = pl.pallas_call(
        two_embedding_sum_kernel,
        out_shape=jax.ShapeDtypeStruct((B_p, C_p), jnp.float32),
        grid=grid,
        in_specs=in_specs,
        out_specs=out_specs,
        compiler_params=pltpu.CompilerParams(
            dimension_semantics=("parallel",),
            vmem_limit_bytes=vmem_limit),
        cost_estimate=cost,
    )(x_large_p, x_small_p, w_dec_p, b_dec_p, w_sm_p, b_sm_p,
      w1_p, b1_p, w2_p, b2_p, w3_p, b3_p)

    # Slice padded batch rows and padded class lanes back off.
    return out_p[:B, :C]


def reference_forward(x1, x2, params):
    """Plain-JAX reference (mirrors the torch module, sqrt+divide normalize)."""
    if x1.shape[1] > x2.shape[1]:
        x_large, x_small = x1, x2
    else:
        x_large, x_small = x2, x1
    w_dec, b_dec = params["decrease"]
    w_sm, b_sm = params["smaller"]

    def norm(x):
        n = jnp.sqrt(jnp.sum(x * x, axis=1, keepdims=True))
        return x / jnp.maximum(n, EPS)

    a = norm(x_large @ w_dec + b_dec)
    b = norm(x_small @ w_sm + b_sm)
    s = a + b
    w1, b1 = params["fc1"]
    w2, b2 = params["fc2"]
    w3, b3 = params["fc3"]
    h1 = jnp.maximum(s @ w1 + b1, 0.0)
    h2 = jnp.maximum(h1 @ w2 + b2, 0.0)
    return h2 @ w3 + b3


if __name__ == "__main__":
    # small, deterministic example shapes
    EMBED_DIM1 = 128   # larger embedding
    EMBED_DIM2 = 64    # smaller embedding -> smaller_dim = 64
    NUM_CLASSES = 16

    key = jax.random.PRNGKey(0)
    k_x1, k_x2, k_p = jax.random.split(key, 3)
    params = init_params(k_p, EMBED_DIM1, EMBED_DIM2, NUM_CLASSES)

    # 1) f32 path, tiny batch (grid collapses to one step).
    B = 8
    x1 = jax.random.normal(k_x1, (B, EMBED_DIM1), jnp.float32)
    x2 = jax.random.normal(k_x2, (B, EMBED_DIM2), jnp.float32)
    out = jax.block_until_ready(two_embedding_sum_forward(x1, x2, params, NUM_CLASSES))
    ref = jax.block_until_ready(reference_forward(x1, x2, params))
    assert out.shape == (B, NUM_CLASSES)
    assert jnp.allclose(out, ref, atol=1e-4, rtol=1e-4), "f32 small-batch mismatch"

    # 2) f32 path, ragged medium batch (exercises batch padding + 2-step grid
    #    so the "parallel" axis can shard across v7x TensorCores).
    B2 = 40
    x1b = jax.random.normal(jax.random.PRNGKey(1), (B2, EMBED_DIM1), jnp.float32)
    x2b = jax.random.normal(jax.random.PRNGKey(2), (B2, EMBED_DIM2), jnp.float32)
    out2 = jax.block_until_ready(two_embedding_sum_forward(x1b, x2b, params, NUM_CLASSES))
    ref2 = jax.block_until_ready(reference_forward(x1b, x2b, params))
    assert out2.shape == (B2, NUM_CLASSES)
    assert jnp.allclose(out2, ref2, atol=1e-4, rtol=1e-4), "f32 medium-batch mismatch"

    # 3) bf16 matmul path (f32 accumulation / normalize), looser tolerance.
    out_bf = jax.block_until_ready(
        two_embedding_sum_forward(x1, x2, params, NUM_CLASSES, use_bf16=True))
    assert out_bf.shape == (B, NUM_CLASSES)
    assert jnp.allclose(out_bf, ref, atol=5e-2, rtol=5e-2), "bf16 path mismatch"

    print("KERNEL_OK")
</pallas_src>

<mosaic_0001>
module attributes {stable_mosaic.version = 11 : i64} {
  func.func @two_embedding_sum_kernel(%arg0: i32, %arg1: memref<8x128xf32, #tpu.memory_space<vmem>>, %arg2: memref<8x128xf32, #tpu.memory_space<vmem>>, %arg3: memref<128x128xf32, #tpu.memory_space<vmem>>, %arg4: memref<1x128xf32, #tpu.memory_space<vmem>>, %arg5: memref<128x128xf32, #tpu.memory_space<vmem>>, %arg6: memref<1x128xf32, #tpu.memory_space<vmem>>, %arg7: memref<128x1024xf32, #tpu.memory_space<vmem>>, %arg8: memref<1x1024xf32, #tpu.memory_space<vmem>>, %arg9: memref<1024x256xf32, #tpu.memory_space<vmem>>, %arg10: memref<1x256xf32, #tpu.memory_space<vmem>>, %arg11: memref<256x128xf32, #tpu.memory_space<vmem>>, %arg12: memref<1x128xf32, #tpu.memory_space<vmem>>, %arg13: memref<8x128xf32, #tpu.memory_space<vmem>>) attributes {dimension_semantics = [#tpu.dimension_semantics<parallel>], iteration_bounds = array<i64: 1>, scalar_prefetch = 0 : i64, scratch_operands = 0 : i64, tpu.core_type = #tpu.core_type<tc>, window_params = [{transform_indices = @transform_0, window_bounds = array<i64: 8, 128>}, {transform_indices = @transform_1, window_bounds = array<i64: 8, 128>}, {pipeline_mode = #tpu.pipeline_mode<synchronous>, transform_indices = @transform_2, window_bounds = array<i64: 128, 128>}, {pipeline_mode = #tpu.pipeline_mode<synchronous>, transform_indices = @transform_3, window_bounds = array<i64: 1, 128>}, {pipeline_mode = #tpu.pipeline_mode<synchronous>, transform_indices = @transform_4, window_bounds = array<i64: 128, 128>}, {pipeline_mode = #tpu.pipeline_mode<synchronous>, transform_indices = @transform_5, window_bounds = array<i64: 1, 128>}, {pipeline_mode = #tpu.pipeline_mode<synchronous>, transform_indices = @transform_6, window_bounds = array<i64: 128, 1024>}, {pipeline_mode = #tpu.pipeline_mode<synchronous>, transform_indices = @transform_7, window_bounds = array<i64: 1, 1024>}, {pipeline_mode = #tpu.pipeline_mode<synchronous>, transform_indices = @transform_8, window_bounds = array<i64: 1024, 256>}, {pipeline_mode = #tpu.pipeline_mode<synchronous>, transform_indices = @transform_9, window_bounds = array<i64: 1, 256>}, {pipeline_mode = #tpu.pipeline_mode<synchronous>, transform_indices = @transform_10, window_bounds = array<i64: 256, 128>}, {pipeline_mode = #tpu.pipeline_mode<synchronous>, transform_indices = @transform_11, window_bounds = array<i64: 1, 128>}, {transform_indices = @transform_12, window_bounds = array<i64: 8, 128>}]} {
    %c0 = arith.constant 0 : index
    %c0_0 = arith.constant 0 : index
    %0 = vector.load %arg1[%c0, %c0_0] : memref<8x128xf32, #tpu.memory_space<vmem>>, vector<8x128xf32>
    %c0_1 = arith.constant 0 : index
    %c0_2 = arith.constant 0 : index
    %1 = vector.load %arg3[%c0_1, %c0_2] : memref<128x128xf32, #tpu.memory_space<vmem>>, vector<128x128xf32>
    %cst = arith.constant dense<0.000000e+00> : vector<8x128xf32>
    %2 = tpu.matmul %0, %1, %cst {dimension_numbers = #tpu.dot_dimension_numbers<[1], [0], [0], [1], [0, 0, 1, 1], [], []>} : vector<8x128xf32>, vector<128x128xf32>, vector<8x128xf32> -> vector<8x128xf32>
    %c0_3 = arith.constant 0 : index
    %c0_4 = arith.constant 0 : index
    %3 = vector.load %arg4[%c0_3, %c0_4] : memref<1x128xf32, #tpu.memory_space<vmem>>, vector<1x128xf32>
    %4 = vector.broadcast %3 : vector<1x128xf32> to vector<8x128xf32>
    %5 = arith.addf %2, %4 : vector<8x128xf32>
    %6 = arith.mulf %5, %5 : vector<8x128xf32>
    %cst_5 = arith.constant dense<0.000000e+00> : vector<8xf32>
    %7 = vector.multi_reduction <add>, %6, %cst_5 [1] : vector<8x128xf32> to vector<8xf32>
    %8 = vector.shape_cast %7 : vector<8xf32> to vector<8x1xf32>
    %cst_6 = arith.constant 1.000000e-24 : f32
    %9 = vector.broadcast %cst_6 : f32 to vector<8x1xf32>
    %10 = arith.maximumf %8, %9 : vector<8x1xf32>
    %11 = math.rsqrt %10 : vector<8x1xf32>
    %12 = vector.broadcast %11 : vector<8x1xf32> to vector<8x128xf32>
    %13 = arith.mulf %5, %12 : vector<8x128xf32>
    %c0_7 = arith.constant 0 : index
    %c0_8 = arith.constant 0 : index
    %14 = vector.load %arg2[%c0_7, %c0_8] : memref<8x128xf32, #tpu.memory_space<vmem>>, vector<8x128xf32>
    %c0_9 = arith.constant 0 : index
    %c0_10 = arith.constant 0 : index
    %15 = vector.load %arg5[%c0_9, %c0_10] : memref<128x128xf32, #tpu.memory_space<vmem>>, vector<128x128xf32>
    %cst_11 = arith.constant dense<0.000000e+00> : vector<8x128xf32>
    %16 = tpu.matmul %14, %15, %cst_11 {dimension_numbers = #tpu.dot_dimension_numbers<[1], [0], [0], [1], [0, 0, 1, 1], [], []>} : vector<8x128xf32>, vector<128x128xf32>, vector<8x128xf32> -> vector<8x128xf32>
    %c0_12 = arith.constant 0 : index
    %c0_13 = arith.constant 0 : index
    %17 = vector.load %arg6[%c0_12, %c0_13] : memref<1x128xf32, #tpu.memory_space<vmem>>, vector<1x128xf32>
    %18 = vector.broadcast %17 : vector<1x128xf32> to vector<8x128xf32>
    %19 = arith.addf %16, %18 : vector<8x128xf32>
    %20 = arith.mulf %19, %19 : vector<8x128xf32>
    %cst_14 = arith.constant dense<0.000000e+00> : vector<8xf32>
    %21 = vector.multi_reduction <add>, %20, %cst_14 [1] : vector<8x128xf32> to vector<8xf32>
    %22 = vector.shape_cast %21 : vector<8xf32> to vector<8x1xf32>
    %cst_15 = arith.constant 1.000000e-24 : f32
    %23 = vector.broadcast %cst_15 : f32 to vector<8x1xf32>
    %24 = arith.maximumf %22, %23 : vector<8x1xf32>
    %25 = math.rsqrt %24 : vector<8x1xf32>
    %26 = vector.broadcast %25 : vector<8x1xf32> to vector<8x128xf32>
    %27 = arith.mulf %19, %26 : vector<8x128xf32>
    %28 = arith.addf %13, %27 : vector<8x128xf32>
    %c0_16 = arith.constant 0 : index
    %c0_17 = arith.constant 0 : index
    %29 = vector.load %arg7[%c0_16, %c0_17] : memref<128x1024xf32, #tpu.memory_space<vmem>>, vector<128x1024xf32>
    %cst_18 = arith.constant dense<0.000000e+00> : vector<8x1024xf32>
    %30 = tpu.matmul %28, %29, %cst_18 {dimension_numbers = #tpu.dot_dimension_numbers<[1], [0], [0], [1], [0, 0, 1, 1], [], []>} : vector<8x128xf32>, vector<128x1024xf32>, vector<8x1024xf32> -> vector<8x1024xf32>
    %c0_19 = arith.constant 0 : index
    %c0_20 = arith.constant 0 : index
    %31 = vector.load %arg8[%c0_19, %c0_20] : memref<1x1024xf32, #tpu.memory_space<vmem>>, vector<1x1024xf32>
    %32 = vector.broadcast %31 : vector<1x1024xf32> to vector<8x1024xf32>
    %33 = arith.addf %30, %32 : vector<8x1024xf32>
    %cst_21 = arith.constant 0.000000e+00 : f32
    %34 = vector.broadcast %cst_21 : f32 to vector<8x1024xf32>
    %35 = arith.maximumf %33, %34 : vector<8x1024xf32>
    %c0_22 = arith.constant 0 : index
    %c0_23 = arith.constant 0 : index
    %36 = vector.load %arg9[%c0_22, %c0_23] : memref<1024x256xf32, #tpu.memory_space<vmem>>, vector<1024x256xf32>
    %cst_24 = arith.constant dense<0.000000e+00> : vector<8x256xf32>
    %37 = tpu.matmul %35, %36, %cst_24 {dimension_numbers = #tpu.dot_dimension_numbers<[1], [0], [0], [1], [0, 0, 1, 1], [], []>} : vector<8x1024xf32>, vector<1024x256xf32>, vector<8x256xf32> -> vector<8x256xf32>
    %c0_25 = arith.constant 0 : index
    %c0_26 = arith.constant 0 : index
    %38 = vector.load %arg10[%c0_25, %c0_26] : memref<1x256xf32, #tpu.memory_space<vmem>>, vector<1x256xf32>
    %39 = vector.broadcast %38 : vector<1x256xf32> to vector<8x256xf32>
    %40 = arith.addf %37, %39 : vector<8x256xf32>
    %cst_27 = arith.constant 0.000000e+00 : f32
    %41 = vector.broadcast %cst_27 : f32 to vector<8x256xf32>
    %42 = arith.maximumf %40, %41 : vector<8x256xf32>
    %c0_28 = arith.constant 0 : index
    %c0_29 = arith.constant 0 : index
    %43 = vector.load %arg11[%c0_28, %c0_29] : memref<256x128xf32, #tpu.memory_space<vmem>>, vector<256x128xf32>
    %cst_30 = arith.constant dense<0.000000e+00> : vector<8x128xf32>
    %44 = tpu.matmul %42, %43, %cst_30 {dimension_numbers = #tpu.dot_dimension_numbers<[1], [0], [0], [1], [0, 0, 1, 1], [], []>} : vector<8x256xf32>, vector<256x128xf32>, vector<8x128xf32> -> vector<8x128xf32>
    %c0_31 = arith.constant 0 : index
    %c0_32 = arith.constant 0 : index
    %45 = vector.load %arg12[%c0_31, %c0_32] : memref<1x128xf32, #tpu.memory_space<vmem>>, vector<1x128xf32>
    %46 = vector.broadcast %45 : vector<1x128xf32> to vector<8x128xf32>
    %47 = arith.addf %44, %46 : vector<8x128xf32>
    %c0_33 = arith.constant 0 : index
    %c0_34 = arith.constant 0 : index
    %48 = vector.load %arg13[%c0_33, %c0_34] : memref<8x128xf32, #tpu.memory_space<vmem>>, vector<8x128xf32>
    tpu.vector_store %arg13[%c0_33, %c0_34], %47 {strides = array<i32>} : memref<8x128xf32, #tpu.memory_space<vmem>>, vector<8x128xf32>,
    return
  }
  func.func @transform_0(%arg0: i32) -> (i32, i32) {
    %c0_i32 = arith.constant 0 : i32
    %c0_i32_0 = arith.constant 0 : i32
    return %arg0, %c0_i32 : i32, i32
  }
  func.func @transform_1(%arg0: i32) -> (i32, i32) {
    %c0_i32 = arith.constant 0 : i32
    %c0_i32_0 = arith.constant 0 : i32
    return %arg0, %c0_i32 : i32, i32
  }
  func.func @transform_2(%arg0: i32) -> (i32, i32) {
    %c0_i32 = arith.constant 0 : i32
    %c0_i32_0 = arith.constant 0 : i32
    %c0_i32_1 = arith.constant 0 : i32
    return %c0_i32, %c0_i32_0 : i32, i32
  }
  func.func @transform_3(%arg0: i32) -> (i32, i32) {
    %c0_i32 = arith.constant 0 : i32
    %c0_i32_0 = arith.constant 0 : i32
    %c0_i32_1 = arith.constant 0 : i32
    return %c0_i32, %c0_i32_0 : i32, i32
  }
  func.func @transform_4(%arg0: i32) -> (i32, i32) {
    %c0_i32 = arith.constant 0 : i32
    %c0_i32_0 = arith.constant 0 : i32
    %c0_i32_1 = arith.constant 0 : i32
    return %c0_i32, %c0_i32_0 : i32, i32
  }
  func.func @transform_5(%arg0: i32) -> (i32, i32) {
    %c0_i32 = arith.constant 0 : i32
    %c0_i32_0 = arith.constant 0 : i32
    %c0_i32_1 = arith.constant 0 : i32
    return %c0_i32, %c0_i32_0 : i32, i32
  }
  func.func @transform_6(%arg0: i32) -> (i32, i32) {
    %c0_i32 = arith.constant 0 : i32
    %c0_i32_0 = arith.constant 0 : i32
    %c0_i32_1 = arith.constant 0 : i32
    return %c0_i32, %c0_i32_0 : i32, i32
  }
  func.func @transform_7(%arg0: i32) -> (i32, i32) {
    %c0_i32 = arith.constant 0 : i32
    %c0_i32_0 = arith.constant 0 : i32
    %c0_i32_1 = arith.constant 0 : i32
    return %c0_i32, %c0_i32_0 : i32, i32
  }
  func.func @transform_8(%arg0: i32) -> (i32, i32) {
    %c0_i32 = arith.constant 0 : i32
    %c0_i32_0 = arith.constant 0 : i32
    %c0_i32_1 = arith.constant 0 : i32
    return %c0_i32, %c0_i32_0 : i32, i32
  }
  func.func @transform_9(%arg0: i32) -> (i32, i32) {
    %c0_i32 = arith.constant 0 : i32
    %c0_i32_0 = arith.constant 0 : i32
    %c0_i32_1 = arith.constant 0 : i32
    return %c0_i32, %c0_i32_0 : i32, i32
  }
  func.func @transform_10(%arg0: i32) -> (i32, i32) {
    %c0_i32 = arith.constant 0 : i32
    %c0_i32_0 = arith.constant 0 : i32
    %c0_i32_1 = arith.constant 0 : i32
    return %c0_i32, %c0_i32_0 : i32, i32
  }
  func.func @transform_11(%arg0: i32) -> (i32, i32) {
    %c0_i32 = arith.constant 0 : i32
    %c0_i32_0 = arith.constant 0 : i32
    %c0_i32_1 = arith.constant 0 : i32
    return %c0_i32, %c0_i32_0 : i32, i32
  }
  func.func @transform_12(%arg0: i32) -> (i32, i32) {
    %c0_i32 = arith.constant 0 : i32
    %c0_i32_0 = arith.constant 0 : i32
    return %arg0, %c0_i32 : i32, i32
  }
}

</mosaic_0001>

<bundles_post_ra>
// kernel: tpu_custom_call.1
= control target key start
LH: loop header
LB: loop body
LE: loop exit
PB: predicated region body
PF: predicated region fallthrough
CT: control target
= control target key end

     0   :  { %17 = vsyncpa [#allocation3], 0  ;;  %s2578_s0 = inlined_call_operand.hbm [shape: f32[8,128], index: 0, kind: input, shape index: {}]   ;;  %s2579_s1 = inlined_call_operand.hbm [shape: f32[8,128], index: 1, kind: input, shape index: {}]   ;;  %s2580_s2 = inlined_call_operand.hbm [shape: f32[128,128], index: 2, kind: input, shape index: {}]   ;;  %s2581_s3 = inlined_call_operand.vmem [shape: f32[1,128], index: 3, kind: input, shape index: {}]   ;;  %s2582_s4 = inlined_call_operand.hbm [shape: f32[128,128], index: 4, kind: input, shape index: {}]   ;;  %s2583_s5 = inlined_call_operand.vmem [shape: f32[1,128], index: 5, kind: input, shape index: {}]   ;;  %s2584_s6 = inlined_call_operand.hbm [shape: f32[128,1024], index: 6, kind: input, shape index: {}]   ;;  %s2585_s7 = inlined_call_operand.vmem [shape: f32[1,1024], index: 7, kind: input, shape index: {}]   ;;  %s2586_s8 = inlined_call_operand.hbm [shape: f32[1024,256], index: 8, kind: input, shape index: {}]   ;;  %s2587_s9 = inlined_call_operand.vmem [shape: f32[1,256], index: 9, kind: input, shape index: {}]   ;;  %s2588_s10 = inlined_call_operand.hbm [shape: f32[256,128], index: 10, kind: input, shape index: {}]   ;;  %s2589_s11 = inlined_call_operand.vmem [shape: f32[1,128], index: 11, kind: input, shape index: {}]   ;;  %s2590_s12 = inlined_call_operand.hbm [shape: f32[8,128], index: 12, kind: output, shape index: {}]  }
   0x1   :  { %18 = vsyncpa [#allocation6], 0 }
   0x2   :  { %19 = vsyncpa [#allocation9], 0 }
   0x3   :  { %20 = vsyncpa [#allocation12], 0 }
   0x4   :  { %21 = vsyncpa [#allocation4], 0  ;;  %s2299_s21 = smov [#allocation5]   ;;  %s2113_s25 = scalar_lea.hbm %s2579_s1, 128 }
   0x5   :  { %s38_s22 = sshll.u32 %s2299_s21, 4  ;;  %p2114_p0 = scmp.ne.s32.totalorder %s2579_s1, %s2113_s25  ;;  %s39_s22 = int_to_ptr.vmem [resolvable:$true] %s38_s22 }
   0x6   :  { %p2117_p1 = scmp.lt.u32.totalorder %s2113_s25, %s2579_s1 }
   0x8   :  { %p2119_p2 = pnand %p2117_p1, %p2114_p0 }
   0xa   :  { %2122 = shalt.err (!%p2119_p2)
}
   0xb   :  { %s2123_s30 = scalar_lea.vmem %s39_s22, 128  ;;  %p2128_p4 = scmp.lt.s32.totalorder %s39_s22, %s39_s22 }
   0xc   :  { %p2124_p3 = scmp.ne.s32.totalorder %s39_s22, %s2123_s30  ;;  %p2129_p5 = scmp.lt.s32.totalorder %s2123_s30, %s2123_s30 }
   0xe   :  { %p2130_p6 = por %p2129_p5, %p2128_p4 }
  0x10   :  { %p2131_p7 = pnand %p2130_p6, %p2124_p3 }
  0x12   :  { %2134 = shalt.err (!%p2131_p7)
}
  0x13   :  { %41 = dma.hbm_to_vmem [thread:$0]  %s2579_s1, 128, %s39_s22, [#allocation6]  }
  0x14   :  { %s2300_s15 = smov [#allocation8]   ;;  %s2301_s17 = smov [#allocation11]  }
  0x15   :  { %s61_s16 = sshll.u32 %s2300_s15, 4  ;;  %s89_s18 = sshll.u32 %s2301_s17, 4  ;;  %s62_s16 = int_to_ptr.vmem [resolvable:$true] %s61_s16  ;;  %s90_s18 = int_to_ptr.vmem [resolvable:$true] %s89_s18 }
  0x16   :  { %s2135_s21 = scalar_lea.hbm %s2582_s4, 2048 }
  0x17   :  { %p2136_p8 = scmp.ne.s32.totalorder %s2582_s4, %s2135_s21  ;;  %p2139_p9 = scmp.lt.u32.totalorder %s2135_s21, %s2582_s4 }
  0x19   :  { %p2141_p10 = pnand %p2139_p9, %p2136_p8 }
  0x1b   :  { %2144 = shalt.err (!%p2141_p10)
}
  0x1c   :  { %s2145_s1 = scalar_lea.vmem %s62_s16, 2048  ;;  %p2150_p12 = scmp.lt.s32.totalorder %s62_s16, %s62_s16 }
  0x1d   :  { %p2146_p11 = scmp.ne.s32.totalorder %s62_s16, %s2145_s1  ;;  %p2151_p13 = scmp.lt.s32.totalorder %s2145_s1, %s2145_s1 }
  0x1f   :  { %p2152_p0 = por %p2151_p13, %p2150_p12 }
  0x21   :  { %p2153_p1 = pnand %p2152_p0, %p2146_p11 }
  0x23   :  { %2156 = shalt.err (!%p2153_p1)
}
  0x24   :  { %s2302_s22 = smov 128   ;;  %s2303_s27 = smov 8  }
  0x25   :  { %67 = dma.hbm_to_vmem [thread:$0]  %s2582_s4, 2048, %s62_s16, [#allocation9], %s2302_s22, %s2302_s22, %s2303_s27  }
  0x26   :  { %s2157_s14 = scalar_lea.hbm %s2586_s8, 32768 }
  0x27   :  { %p2158_p2 = scmp.ne.s32.totalorder %s2586_s8, %s2157_s14  ;;  %p2161_p3 = scmp.lt.u32.totalorder %s2157_s14, %s2586_s8 }
  0x29   :  { %p2163_p4 = pnand %p2161_p3, %p2158_p2 }
  0x2b   :  { %2166 = shalt.err (!%p2163_p4)
}
  0x2c   :  { %s2167_s21 = scalar_lea.vmem %s90_s18, 32768  ;;  %p2172_p6 = scmp.lt.s32.totalorder %s90_s18, %s90_s18 }
  0x2d   :  { %p2168_p5 = scmp.ne.s32.totalorder %s90_s18, %s2167_s21  ;;  %p2173_p7 = scmp.lt.s32.totalorder %s2167_s21, %s2167_s21 }
  0x2f   :  { %p2174_p8 = por %p2173_p7, %p2172_p6 }
  0x31   :  { %p2175_p9 = pnand %p2174_p8, %p2168_p5 }
  0x33   :  { %2178 = shalt.err (!%p2175_p9)
}
  0x34   :  { %s2304_s4 = smov 256   ;;  %s2305_s16 = smov 16  }
  0x35   :  { %95 = dma.hbm_to_vmem [thread:$0]  %s2586_s8, 32768, %s90_s18, [#allocation12], %s2304_s4, %s2304_s4, %s2305_s16  }
  0x36   :  { %s2306_s25 = smov [#allocation2]   ;;  %s2307_s1 = smov [#allocation7]  }
  0x37   :  { %s28_s26 = sshll.u32 %s2306_s25, 4  ;;  %s47_s28 = sshll.u32 %s2307_s1, 4  ;;  %s29_s26 = int_to_ptr.vmem [resolvable:$true] %s28_s26  ;;  %s48_s28 = int_to_ptr.vmem [resolvable:$true] %s47_s28 }
  0x38   :  { %s2179_s13 = scalar_lea.hbm %s2578_s0, 128 }
  0x39   :  { %p2180_p10 = scmp.ne.s32.totalorder %s2578_s0, %s2179_s13  ;;  %p2183_p11 = scmp.lt.u32.totalorder %s2179_s13, %s2578_s0 }
  0x3b   :  { %p2185_p12 = pnand %p2183_p11, %p2180_p10 }
  0x3d   :  { %2188 = shalt.err (!%p2185_p12)
}
  0x3e   :  { %s2189_s8 = scalar_lea.vmem %s29_s26, 128  ;;  %p2194_p0 = scmp.lt.s32.totalorder %s29_s26, %s29_s26 }
  0x3f   :  { %p2190_p13 = scmp.ne.s32.totalorder %s29_s26, %s2189_s8  ;;  %p2195_p1 = scmp.lt.s32.totalorder %s2189_s8, %s2189_s8 }
  0x41   :  { %p2196_p2 = por %p2195_p1, %p2194_p0 }
  0x43   :  { %p2197_p3 = pnand %p2196_p2, %p2190_p13 }
  0x45   :  { %2200 = shalt.err (!%p2197_p3)
}
  0x46   :  { %31 = dma.hbm_to_vmem [thread:$0]  %s2578_s0, 128, %s29_s26, [#allocation3]  }
  0x47   :  { %s2201_s16 = scalar_lea.hbm %s2580_s2, 2048 }
  0x48   :  { %p2202_p4 = scmp.ne.s32.totalorder %s2580_s2, %s2201_s16  ;;  %p2205_p5 = scmp.lt.u32.totalorder %s2201_s16, %s2580_s2 }
  0x4a   :  { %p2207_p6 = pnand %p2205_p5, %p2202_p4 }
  0x4c   :  { %2210 = shalt.err (!%p2207_p6)
}
  0x4d   :  { %s2211_s29 = scalar_lea.vmem %s48_s28, 2048  ;;  %p2216_p8 = scmp.lt.s32.totalorder %s48_s28, %s48_s28 }
  0x4e   :  { %p2212_p7 = scmp.ne.s32.totalorder %s48_s28, %s2211_s29  ;;  %p2217_p9 = scmp.lt.s32.totalorder %s2211_s29, %s2211_s29 }
  0x50   :  { %p2218_p10 = por %p2217_p9, %p2216_p8 }
  0x52   :  { %p2219_p11 = pnand %p2218_p10, %p2212_p7 }
  0x54   :  { %2222 = shalt.err (!%p2219_p11)
}
  0x55   :  { %53 = dma.hbm_to_vmem [thread:$0]  %s2580_s2, 2048, %s48_s28, [#allocation6], %s2302_s22, %s2302_s22, %s2303_s27  }
  0x56   :  { %s2308_s30 = smov [#allocation10]   ;;  %s2223_s17 = scalar_lea.hbm %s2584_s6, 16384 }
  0x57   :  { %s75_s13 = sshll.u32 %s2308_s30, 4  ;;  %p2224_p12 = scmp.ne.s32.totalorder %s2584_s6, %s2223_s17  ;;  %s76_s13 = int_to_ptr.vmem [resolvable:$true] %s75_s13 }
  0x58   :  { %p2227_p13 = scmp.lt.u32.totalorder %s2223_s17, %s2584_s6 }
  0x5a   :  { %p2229_p0 = pnand %p2227_p13, %p2224_p12 }
  0x5c   :  { %2232 = shalt.err (!%p2229_p0)
}
  0x5d   :  { %s2233_s21 = scalar_lea.vmem %s76_s13, 16384  ;;  %p2238_p2 = scmp.lt.s32.totalorder %s76_s13, %s76_s13 }
  0x5e   :  { %p2234_p1 = scmp.ne.s32.totalorder %s76_s13, %s2233_s21  ;;  %p2239_p3 = scmp.lt.s32.totalorder %s2233_s21, %s2233_s21 }
  0x60   :  { %p2240_p4 = por %p2239_p3, %p2238_p2 }
  0x62   :  { %p2241_p5 = pnand %p2240_p4, %p2234_p1 }
  0x64   :  { %2244 = shalt.err (!%p2241_p5)
}
  0x65   :  { %s2309_s2 = smov 1024   ;;  %s2310_s28 = smov 64  }
  0x66   :  { %81 = dma.hbm_to_vmem [thread:$0]  %s2584_s6, 16384, %s76_s13, [#allocation9], %s2309_s2, %s2309_s2, %s2310_s28  }
  0x67   :  { %s2311_s23 = smov [#allocation13]   ;;  %s2245_s29 = scalar_lea.hbm %s2588_s10, 4096 }
  0x68   :  { %s103_s24 = sshll.u32 %s2311_s23, 4  ;;  %p2246_p6 = scmp.ne.s32.totalorder %s2588_s10, %s2245_s29  ;;  %s104_s24 = int_to_ptr.vmem [resolvable:$true] %s103_s24 }
  0x69   :  { %p2249_p7 = scmp.lt.u32.totalorder %s2245_s29, %s2588_s10 }
  0x6b   :  { %p2251_p8 = pnand %p2249_p7, %p2246_p6 }
  0x6d   :  { %2254 = shalt.err (!%p2251_p8)
}
  0x6e   :  { %s2255_s15 = scalar_lea.vmem %s104_s24, 4096  ;;  %p2260_p10 = scmp.lt.s32.totalorder %s104_s24, %s104_s24 }
  0x6f   :  { %p2256_p9 = scmp.ne.s32.totalorder %s104_s24, %s2255_s15  ;;  %p2261_p11 = scmp.lt.s32.totalorder %s2255_s15, %s2255_s15 }
  0x71   :  { %p2262_p12 = por %p2261_p11, %p2260_p10 }
  0x73   :  { %p2263_p13 = pnand %p2262_p12, %p2256_p9 }
  0x75   :  { %2266 = shalt.err (!%p2263_p13)
}
  0x76   :  { %109 = dma.hbm_to_vmem [thread:$0]  %s2588_s10, 4096, %s104_s24, [#allocation12], %s2302_s22, %s2302_s22, %s2303_s27  }
  0x77   :  { %2289 = dma.done.wait [#allocation3], 128  }
  0x78   :  { %2290 = vsyncadd [#allocation3], 4294967168 }
  0x79   :  { %2291 = dma.done.wait [#allocation6], 2176  }
  0x7a   :  { %2292 = vsyncadd [#allocation6], 4294965120 }
  0x7b   :  { %2293 = dma.done.wait [#allocation9], 18432  }
  0x7c   :  { %2294 = vsyncadd [#allocation9], 4294948864 }
  0x7d   :  { %2295 = dma.done.wait [#allocation12], 36864  }
  0x7e   :  { %2296 = vsyncadd [#allocation12], 4294930432  ;;  %v2312_v0 = vmov 0.0|0.0   ;;  %vm2313_vm0 = vmmov 0   ;;  %v2314_v1 = vmov 0.0   ;;  %v134_v2 = vld [vmem:[#allocation7] sm:$0xff] }
  0x7f   :  { %1620 = vmatprep.subr.bf16.mxu1 %v2312_v0  ;;  %1582 = vmatprep.mubr.msk.f32.mxu1 %vm2313_vm0, %v2314_v1  ;;  %v135_v3 = vld [vmem:[#allocation7 + $0x8] sm:$0xff]  ;;  %v136_v4 = vld [vmem:[#allocation7 + $0x10] sm:$0xff]  ;;  %v137_v6 = vld [vmem:[#allocation7 + $0x18] sm:$0xff] }
  0x80   :  { %568 = vmatprep.mubr.f32.mxu0 %v2314_v1  ;;  %v1621_v5 = vpack.c.bf16 %v135_v3, %v134_v2  ;;  %v1624_v7 = vpack.c.bf16 %v137_v6, %v136_v4  ;;  %v138_v8 = vld [vmem:[#allocation7 + $0x20] sm:$0xff]  ;;  %v139_v9 = vld [vmem:[#allocation7 + $0x28] sm:$0xff]  ;;  %v140_v11 = vld [vmem:[#allocation7 + $0x30] sm:$0xff] }
  0x81   :  { %v1627_v10 = vpack.c.bf16 %v139_v9, %v138_v8  ;;  %v141_v12 = vld [vmem:[#allocation7 + $0x38] sm:$0xff]  ;;  %v142_v14 = vld [vmem:[#allocation7 + $0x40] sm:$0xff]  ;;  %v143_v15 = vld [vmem:[#allocation7 + $0x48] sm:$0xff] }
  0x82   :  { %1622 = vmatpush3.bf16.msra.mxu1 %v1621_v5  ;;  %v1630_v13 = vpack.c.bf16 %v141_v12, %v140_v11  ;;  %v1633_v16 = vpack.c.bf16 %v143_v15, %v142_v14  ;;  %v144_v17 = vld [vmem:[#allocation7 + $0x50] sm:$0xff]  ;;  %v145_v18 = vld [vmem:[#allocation7 + $0x58] sm:$0xff]  ;;  %v146_v20 = vld [vmem:[#allocation7 + $0x60] sm:$0xff] }
  0x83   :  { %1623 = vmatprep.subr.bf16.mxu1 %v2312_v0  ;;  %v1636_v19 = vpack.c.bf16 %v145_v18, %v144_v17  ;;  %v147_v21 = vld [vmem:[#allocation7 + $0x68] sm:$0xff]  ;;  %v148_v23 = vld [vmem:[#allocation7 + $0x70] sm:$0xff]  ;;  %v149_v24 = vld [vmem:[#allocation7 + $0x78] sm:$0xff] }
  0x84   :  { %v1639_v22 = vpack.c.bf16 %v147_v21, %v146_v20  ;;  %v1642_v25 = vpack.c.bf16 %v149_v24, %v148_v23  ;;  %v234_v26 = vld [vmem:[#allocation8] sm:$0xff]  ;;  %v235_v27 = vld [vmem:[#allocation8 + $0x8] sm:$0xff]  ;;  %v133_v28 = vld [vmem:[#allocation2] sm:$0xff] }
  0x85   :  { %v1645_v29 = vpack.c.bf16 %v235_v27, %v234_v26  ;;  %v236_v30 = vld [vmem:[#allocation8 + $0x10] sm:$0xff]  ;;  %v237_v31 = vld [vmem:[#allocation8 + $0x18] sm:$0xff]  ;;  %v238_v33 = vld [vmem:[#allocation8 + $0x20] sm:$0xff] }
  0x86   :  { %1625 = vmatpush3.bf16.msra.mxu1 %v1624_v7  ;;  %v1648_v32 = vpack.c.bf16 %v237_v31, %v236_v30  ;;  %v239_v34 = vld [vmem:[#allocation8 + $0x28] sm:$0xff]  ;;  %v240_v36 = vld [vmem:[#allocation8 + $0x30] sm:$0xff]  ;;  %v241_v37 = vld [vmem:[#allocation8 + $0x38] sm:$0xff] }
  0x87   :  { %1626 = vmatprep.subr.bf16.mxu1 %v2312_v0  ;;  %v1651_v35 = vpack.c.bf16 %v239_v34, %v238_v33  ;;  %v1654_v38 = vpack.c.bf16 %v241_v37, %v240_v36  ;;  %v242_v39 = vld [vmem:[#allocation8 + $0x40] sm:$0xff]  ;;  %v243_v40 = vld [vmem:[#allocation8 + $0x48] sm:$0xff]  ;;  %v244_v42 = vld [vmem:[#allocation8 + $0x50] sm:$0xff] }
  0x88   :  { %v1657_v41 = vpack.c.bf16 %v243_v40, %v242_v39  ;;  %v245_v43 = vld [vmem:[#allocation8 + $0x58] sm:$0xff]  ;;  %v246_v45 = vld [vmem:[#allocation8 + $0x60] sm:$0xff]  ;;  %v247_v46 = vld [vmem:[#allocation8 + $0x68] sm:$0xff] }
  0x89   :  { %v1660_v44 = vpack.c.bf16 %v245_v43, %v244_v42  ;;  %v1663_v47 = vpack.c.bf16 %v247_v46, %v246_v45  ;;  %v248_v48 = vld [vmem:[#allocation8 + $0x70] sm:$0xff]  ;;  %v249_v49 = vld [vmem:[#allocation8 + $0x78] sm:$0xff]  ;;  %v335_v57 = vld [vmem:[#allocation10 + $0x8] sm:$0xff] }
  0x8a   :  { %1628 = vmatpush3.bf16.msra.mxu1 %v1627_v10  ;;  %v1666_v50 = vpack.c.bf16 %v249_v49, %v248_v48  ;;  %v233_v51 = vld [vmem:[#allocation5] sm:$0xff]  ;;  %v1478_v52 = vld [vmem:[%s2581_s3] ss:$0 sm:$0xff]  ;;  %v343_v58 = vld [vmem:[#allocation10 + $0x48] sm:$0xff] }
  0x8b   :  { %1629 = vmatprep.subr.bf16.mxu1 %v2312_v0  ;;  %v337_v59 = vld [vmem:[#allocation10 + $0x18] sm:$0xff]  ;;  %v1668_v60 = vpack.c.bf16 %v343_v58, %v335_v57  ;;  %v334_v62 = vld [vmem:[#allocation10] sm:$0xff]  ;;  %v336_v3 = vld [vmem:[#allocation10 + $0x10] sm:$0xff] }
  0x8c   :  { %v345_v61 = vld [vmem:[#allocation10 + $0x58] sm:$0xff]  ;;  %v342_v63 = vld [vmem:[#allocation10 + $0x40] sm:$0xff]  ;;  %v344_v4 = vld [vmem:[#allocation10 + $0x50] sm:$0xff] }
  0x8d   :  { %v1670_v2 = vpack.c.bf16 %v342_v63, %v334_v62  ;;  %v351_v5 = vld [vmem:[#allocation10 + $0x88] sm:$0xff]  ;;  %1669 = vmatprep.subr.bf16.mxu0 %v1668_v60  ;;  %v1702_v6 = vpack.c.bf16 %v344_v4, %v336_v3  ;;  %v353_v8 = vld [vmem:[#allocation10 + $0x98] sm:$0xff]  ;;  %v350_v12 = vld [vmem:[#allocation10 + $0x80] sm:$0xff] }
  0x8e   :  { %1631 = vmatpush3.bf16.msra.mxu1 %v1630_v13  ;;  %v359_v7 = vld [vmem:[#allocation10 + $0xc8] sm:$0xff]  ;;  %v361_v9 = vld [vmem:[#allocation10 + $0xd8] sm:$0xff]  ;;  %v358_v13 = vld [vmem:[#allocation10 + $0xc0] sm:$0xff] }
  0x8f   :  { %1632 = vmatprep.subr.bf16.mxu1 %v2312_v0  ;;  %1671 = vmatpush1.bf16.msra.mxu0 %v1670_v2  ;;  %v1672_v10 = vpack.c.bf16 %v359_v7, %v351_v5  ;;  %v1704_v11 = vpack.c.bf16 %v361_v9, %v353_v8  ;;  %v352_v14 = vld [vmem:[#allocation10 + $0x90] sm:$0xff]  ;;  %v1674_v15 = vpack.c.bf16 %v358_v13, %v350_v12  ;;  %v367_v17 = vld [vmem:[#allocation10 + $0x108] sm:$0xff]  ;;  %v369_v21 = vld [vmem:[#allocation10 + $0x118] sm:$0xff] }
  0x90   :  { %v375_v18 = vld [vmem:[#allocation10 + $0x148] sm:$0xff]  ;;  %v366_v23 = vld [vmem:[#allocation10 + $0x100] sm:$0xff]  ;;  %v1479_v24 = vld [vmem:[%s2583_s5] ss:$0 sm:$0xff] }
  0x91   :  { %1673 = vmatprep.subr.bf16.mxu0 %v1672_v10  ;;  %v1676_v20 = vpack.c.bf16 %v375_v18, %v367_v17  ;;  %v374_v26 = vld [vmem:[#allocation10 + $0x140] sm:$0xff]  ;;  %v368_v27 = vld [vmem:[#allocation10 + $0x110] sm:$0xff]  ;;  %v383_v30 = vld [vmem:[#allocation10 + $0x188] sm:$0xff] }
  0x92   :  { %1634 = vmatpush3.bf16.msra.mxu1 %v1633_v16  ;;  %v360_v16 = vld [vmem:[#allocation10 + $0xd0] sm:$0xff]  ;;  %v391_v31 = vld [vmem:[#allocation10 + $0x1c8] sm:$0xff]  ;;  %v382_v36 = vld [vmem:[#allocation10 + $0x180] sm:$0xff] }
  0x93   :  { %1635 = vmatprep.subr.bf16.mxu1 %v2312_v0  ;;  %1675 = vmatpush1.bf16.msra.mxu0 %v1674_v15  ;;  %v1680_v34 = vpack.c.bf16 %v391_v31, %v383_v30  ;;  %v390_v37 = vld [vmem:[#allocation10 + $0x1c0] sm:$0xff]  ;;  %v384_v39 = vld [vmem:[#allocation10 + $0x190] sm:$0xff]  ;;  %v407_v48 = vld [vmem:[#allocation10 + $0x248] sm:$0xff] }
  0x94   :  { %1677 = vmatprep.subr.bf16.mxu0 %v1676_v20  ;;  %v392_v40 = vld [vmem:[#allocation10 + $0x1d0] sm:$0xff]  ;;  %v401_v49 = vld [vmem:[#allocation10 + $0x218] sm:$0xff]  ;;  %v415_v60 = vld [vmem:[#allocation10 + $0x288] sm:$0xff] }
  0x95   :  { %v1714_v45 = vpack.c.bf16 %v392_v40, %v384_v39  ;;  %v400_v57 = vld [vmem:[#allocation10 + $0x210] sm:$0xff]  ;;  %v417_v62 = vld [vmem:[#allocation10 + $0x298] sm:$0xff]  ;;  %v414_v2 = vld [vmem:[#allocation10 + $0x280] sm:$0xff] }
  0x96   :  { %1637 = vmatpush3.bf16.msra.mxu1 %v1636_v19  ;;  %v1706_v19 = vpack.c.bf16 %v360_v16, %v352_v14  ;;  %v408_v58 = vld [vmem:[#allocation10 + $0x250] sm:$0xff]  ;;  %v422_v3 = vld [vmem:[#allocation10 + $0x2c0] sm:$0xff]  ;;  %v431_v8 = vld [vmem:[#allocation10 + $0x308] sm:$0xff] }
  0x97   :  { %1638 = vmatprep.subr.bf16.mxu1 %v2312_v0  ;;  %v1690_v5 = vpack.c.bf16 %v422_v3, %v414_v2  ;;  %v424_v7 = vld [vmem:[#allocation10 + $0x2d0] sm:$0xff]  ;;  %v439_v10 = vld [vmem:[#allocation10 + $0x348] sm:$0xff]  ;;  %v441_v12 = vld [vmem:[#allocation10 + $0x358] sm:$0xff] }
  0x98   :  { %v1692_v13 = vpack.c.bf16 %v439_v10, %v431_v8  ;;  %v430_v15 = vld [vmem:[#allocation10 + $0x300] sm:$0xff]  ;;  %v432_v17 = vld [vmem:[#allocation10 + $0x310] sm:$0xff]  ;;  %v447_v20 = vld [vmem:[#allocation10 + $0x388] sm:$0xff] }
  0x99   :  { %v438_v16 = vld [vmem:[#allocation10 + $0x340] sm:$0xff]  ;;  %v456_v30 = vld [vmem:[#allocation10 + $0x3d0] sm:$0xff]  ;;  %v371_v3 = vld [vmem:[#allocation10 + $0x128] sm:$0xff] }
  0x9a   :  { %1640 = vmatpush3.bf16.msra.mxu1 %v1639_v22  ;;  %v377_v22 = vld [vmem:[#allocation10 + $0x158] sm:$0xff]  ;;  %v1694_v18 = vpack.c.bf16 %v438_v16, %v430_v15  ;;  %v364_v2 = vld [vmem:[#allocation10 + $0xf0] sm:$0xff]  ;;  %v378_v8 = vld [vmem:[#allocation10 + $0x160] sm:$0xff] }
  0x9b   :  { %1641 = vmatprep.subr.bf16.mxu1 %v2312_v0  ;;  %v389_v15 = vld [vmem:[#allocation10 + $0x1b8] sm:$0xff] }
  0x9c   :  { %v397_v16 = vld [vmem:[#allocation10 + $0x1f8] sm:$0xff] }
  0x9e   :  { %1643 = vmatpush3.bf16.msra.mxu1 %v1642_v25  ;;  %v1708_v25 = vpack.c.bf16 %v377_v22, %v369_v21  ;;  %v455_v21 = vld [vmem:[#allocation10 + $0x3c8] sm:$0xff] }
  0x9f   :  { %1644 = vmatprep.subr.bf16.mxu1 %v2312_v0 }
  0xa1   :  { %1583 = vmatmul.mubr.f32.vlgmr.msra.gmra.mrb[0].mxu1 %v133_v28  ;;  %v376_v28 = vld [vmem:[#allocation10 + $0x150] sm:$0xff] }
  0xa2   :  { %1646 = vmatpush3.bf16.msra.mxu1 %v1645_v29  ;;  %1617 = vmatprep.mubr.msk.f32.mxu1 %vm2313_vm0, %v2314_v1  ;;  %v1678_v29 = vpack.c.bf16 %v374_v26, %v366_v23  ;;  %v1710_v33 = vpack.c.bf16 %v376_v28, %v368_v27  ;;  %v1696_v23 = vpack.c.bf16 %v455_v21, %v447_v20  ;;  %v446_v26 = vld [vmem:[#allocation10 + $0x380] sm:$0xff] }
  0xa3   :  { %1647 = vmatprep.subr.bf16.mxu1 %v2312_v0  ;;  %v454_v28 = vld [vmem:[#allocation10 + $0x3c0] sm:$0xff] }
  0xa4   :  { %1679 = vmatpush1.bf16.msra.mxu0 %v1678_v29  ;;  %v448_v29 = vld [vmem:[#allocation10 + $0x390] sm:$0xff]  ;;  %v1698_v31 = vpack.c.bf16 %v454_v28, %v446_v26  ;;  %v394_v20 = vld [vmem:[#allocation10 + $0x1e0] sm:$0xff]  ;;  %v411_v26 = vld [vmem:[#allocation10 + $0x268] sm:$0xff] }
  0xa5   :  { %1681 = vmatprep.subr.bf16.mxu0 %v1680_v34  ;;  %v341_v34 = vld [vmem:[#allocation10 + $0x38] sm:$0xff] }
  0xa6   :  { %1649 = vmatpush3.bf16.msra.mxu1 %v1648_v32  ;;  %v385_v32 = vld [vmem:[#allocation10 + $0x198] sm:$0xff] }
  0xa7   :  { %1650 = vmatprep.subr.bf16.mxu1 %v2312_v0  ;;  %v413_v28 = vld [vmem:[#allocation10 + $0x278] sm:$0xff] }
  0xaa   :  { %1652 = vmatpush3.bf16.msra.mxu1 %v1651_v35  ;;  %v393_v35 = vld [vmem:[#allocation10 + $0x1d8] sm:$0xff] }
  0xab   :  { %1653 = vmatprep.subr.bf16.mxu1 %v2312_v0 }
  0xae   :  { %1655 = vmatpush3.bf16.msra.mxu1 %v1654_v38  ;;  %v1712_v38 = vpack.c.bf16 %v393_v35, %v385_v32  ;;  %v339_v32 = vld [vmem:[#allocation10 + $0x28] sm:$0xff]  ;;  %v1730_v35 = vpack.c.bf16 %v456_v30, %v448_v29  ;;  %v402_v30 = vld [vmem:[#allocation10 + $0x220] sm:$0xff] }
  0xaf   :  { %1656 = vmatprep.subr.bf16.mxu1 %v2312_v0 }
  0xb2   :  { %1658 = vmatpush3.bf16.msra.mxu1 %v1657_v41 }
  0xb3   :  { %1659 = vmatprep.subr.bf16.mxu1 %v2312_v0 }
  0xb6   :  { %1661 = vmatpush3.bf16.msra.mxu1 %v1660_v44  ;;  %v1682_v44 = vpack.c.bf16 %v390_v37, %v382_v36  ;;  %v349_v37 = vld [vmem:[#allocation10 + $0x78] sm:$0xff] }
  0xb7   :  { %1662 = vmatprep.subr.bf16.mxu1 %v2312_v0 }
  0xb8   :  { %1683 = vmatpush1.bf16.msra.mxu0 %v1682_v44 }
  0xba   :  { %1664 = vmatpush3.bf16.msra.mxu1 %v1663_v47  ;;  %v399_v47 = vld [vmem:[#allocation10 + $0x208] sm:$0xff] }
  0xbb   :  { %1665 = vmatprep.subr.bf16.mxu1 %v2312_v0  ;;  %v1700_v0 = vpack.c.bf16 %v345_v61, %v337_v59  ;;  %v1718_v59 = vpack.c.bf16 %v408_v58, %v400_v57  ;;  %v423_v61 = vld [vmem:[#allocation10 + $0x2c8] sm:$0xff] }
  0xbc   :  { %v1688_v63 = vpack.c.bf16 %v423_v61, %v415_v60  ;;  %v362_v60 = vld [vmem:[#allocation10 + $0xe0] sm:$0xff] }
  0xbe   :  { %1667 = vmatpush3.bf16.msra.mxu1 %v1666_v50  ;;  %v1684_v50 = vpack.c.bf16 %v407_v48, %v399_v47  ;;  %v340_v47 = vld [vmem:[#allocation10 + $0x30] sm:$0xff] }
  0xbf   :  { %1701 = vmatprep.subr.bf16.mxu1 %v1700_v0  ;;  %v425_v0 = vld [vmem:[#allocation10 + $0x2d8] sm:$0xff]  ;;  %v348_v48 = vld [vmem:[#allocation10 + $0x70] sm:$0xff] }
  0xc0   :  { %1685 = vmatprep.subr.bf16.mxu0 %v1684_v50  ;;  %v1720_v4 = vpack.c.bf16 %v425_v0, %v417_v62  ;;  %v1766_v58 = vpack.c.bf16 %v348_v48, %v340_v47  ;;  %v356_v0 = vld [vmem:[#allocation10 + $0xb0] sm:$0xff] }
  0xc1   :  { %1618 = vmatmul.mubr.f32.vlgmr.msra.gmra.mrb[2].mxu1 %v233_v51  ;;  %v409_v51 = vld [vmem:[#allocation10 + $0x258] sm:$0xff]  ;;  %v420_v47 = vld [vmem:[#allocation10 + $0x2b0] sm:$0xff] }
  0xc2   :  { %639 = vmatprep.mubr.f32.mxu1 %v2314_v1  ;;  %1703 = vmatpush1.bf16.msra.mxu1 %v1702_v6  ;;  %v416_v6 = vld [vmem:[#allocation10 + $0x290] sm:$0xff] }
  0xc3   :  { %1705 = vmatprep.subr.bf16.mxu1 %v1704_v11  ;;  %v1722_v9 = vpack.c.bf16 %v424_v7, %v416_v6  ;;  %v433_v11 = vld [vmem:[#allocation10 + $0x318] sm:$0xff]  ;;  %v370_v7 = vld [vmem:[#allocation10 + $0x120] sm:$0xff]  ;;  %v428_v48 = vld [vmem:[#allocation10 + $0x2f0] sm:$0xff] }
  0xc4   :  { %v1724_v14 = vpack.c.bf16 %v441_v12, %v433_v11  ;;  %v381_v6 = vld [vmem:[#allocation10 + $0x178] sm:$0xff]  ;;  %v372_v11 = vld [vmem:[#allocation10 + $0x130] sm:$0xff] }
  0xc5   :  { %v380_v12 = vld [vmem:[#allocation10 + $0x170] sm:$0xff] }
  0xc6   :  { %1707 = vmatpush1.bf16.msra.mxu1 %v1706_v19  ;;  %v440_v19 = vld [vmem:[#allocation10 + $0x350] sm:$0xff] }
  0xc7   :  { %1709 = vmatprep.subr.bf16.mxu1 %v1708_v25  ;;  %v1726_v22 = vpack.c.bf16 %v440_v19, %v432_v17  ;;  %v457_v25 = vld [vmem:[#allocation10 + $0x3d8] sm:$0xff]  ;;  %v1742_v17 = vpack.c.bf16 %v378_v8, %v370_v7  ;;  %v386_v19 = vld [vmem:[#allocation10 + $0x1a0] sm:$0xff]  ;;  %v452_v8 = vld [vmem:[#allocation10 + $0x3b0] sm:$0xff] }
  0xc8   :  { %v1746_v29 = vpack.c.bf16 %v394_v20, %v386_v19  ;;  %v796_v20 = vld [vmem:[#allocation11] sm:$0xff] }
  0xca   :  { %1711 = vmatpush1.bf16.msra.mxu1 %v1710_v33  ;;  %v347_v33 = vld [vmem:[#allocation10 + $0x68] sm:$0xff] }
  0xcb   :  { %1713 = vmatprep.subr.bf16.mxu1 %v1712_v38  ;;  %v1732_v36 = vpack.c.bf16 %v347_v33, %v339_v32  ;;  %v1764_v38 = vpack.c.bf16 %v349_v37, %v341_v34  ;;  %v404_v34 = vld [vmem:[#allocation10 + $0x230] sm:$0xff]  ;;  %v427_v37 = vld [vmem:[#allocation10 + $0x2e8] sm:$0xff] }
  0xce   :  { %1715 = vmatpush1.bf16.msra.mxu1 %v1714_v45  ;;  %v338_v45 = vld [vmem:[#allocation10 + $0x20] sm:$0xff] }
 0x174   :  { %v223_v53 = vpop.f32.mrb[0].mxu1 }
 0x175   :  { %v2499_v54 = vadd.f32 %v1478_v52, %v223_v53  ;;  %v1584_v55 = vpop.f32.mrb[1].mxu1  ;;  %v398_v52 = vld [vmem:[#allocation10 + $0x200] sm:$0xff] }
 0x176   :  { %v406_v53 = vld [vmem:[#allocation10 + $0x240] sm:$0xff]  ;;  %v1716_v55 = vpack.c.bf16 %v409_v51, %v401_v49  ;;  %v355_v49 = vld [vmem:[#allocation10 + $0xa8] sm:$0xff] }
 0x177   :  { %v227_v56 = vmul.f32 %v2499_v54, %v2499_v54  ;;  %v363_v51 = vld [vmem:[#allocation10 + $0xe8] sm:$0xff] }
 0x178   :  { %1717 = vmatprep.subr.bf16.mxu1 %v1716_v55  ;;  %v1736_v62 = vpack.c.bf16 %v363_v51, %v355_v49  ;;  %v435_v49 = vld [vmem:[#allocation10 + $0x328] sm:$0xff]  ;;  %v437_v51 = vld [vmem:[#allocation10 + $0x338] sm:$0xff] }
 0x179   :  { %228 = vadd.xlane.f32.xlu0 %v227_v56  ;;  %v1686_v56 = vpack.c.bf16 %v406_v53, %v398_v52  ;;  %1719 = vmatpush1.bf16.msra.mxu1 %v1718_v59  ;;  %v357_v52 = vld [vmem:[#allocation10 + $0xb8] sm:$0xff]  ;;  %v354_v59 = vld [vmem:[#allocation10 + $0xa0] sm:$0xff] }
 0x17a   :  { %1721 = vmatprep.subr.bf16.mxu1 %v1720_v4  ;;  %v365_v53 = vld [vmem:[#allocation10 + $0xf8] sm:$0xff]  ;;  %v379_v4 = vld [vmem:[#allocation10 + $0x168] sm:$0xff] }
 0x17b   :  { %1687 = vmatpush1.bf16.msra.mxu0 %v1686_v56 }
 0x17c   :  { %1689 = vmatprep.subr.bf16.mxu0 %v1688_v63  ;;  %v1768_v63 = vpack.c.bf16 %v365_v53, %v357_v52  ;;  %v445_v52 = vld [vmem:[#allocation10 + $0x378] sm:$0xff] }
 0x17d   :  { %1723 = vmatpush1.bf16.msra.mxu1 %v1722_v9  ;;  %v1740_v9 = vpack.c.bf16 %v379_v4, %v371_v3  ;;  %v461_v3 = vld [vmem:[#allocation10 + $0x3f8] sm:$0xff] }
 0x17e   :  { %1725 = vmatprep.subr.bf16.mxu1 %v1724_v14  ;;  %v395_v14 = vld [vmem:[#allocation10 + $0x1e8] sm:$0xff] }
 0x17f   :  { %1691 = vmatpush1.bf16.msra.mxu0 %v1690_v5  ;;  %v373_v5 = vld [vmem:[#allocation10 + $0x138] sm:$0xff] }
 0x180   :  { %1693 = vmatprep.subr.bf16.mxu0 %v1692_v13  ;;  %v1772_v10 = vpack.c.bf16 %v381_v6, %v373_v5  ;;  %v387_v13 = vld [vmem:[#allocation10 + $0x1a8] sm:$0xff]  ;;  %v450_v6 = vld [vmem:[#allocation10 + $0x3a0] sm:$0xff] }
 0x181   :  { %1727 = vmatpush1.bf16.msra.mxu1 %v1726_v22  ;;  %v1744_v21 = vpack.c.bf16 %v395_v14, %v387_v13  ;;  %v1776_v22 = vpack.c.bf16 %v397_v16, %v389_v15  ;;  %v799_v13 = vld [vmem:[#allocation11 + $0x18] sm:$0xff]  ;;  %v860_v16 = vld [vmem:[#allocation11 + $0x200] sm:$0xff] }
 0x183   :  { %1695 = vmatpush1.bf16.msra.mxu0 %v1694_v18  ;;  %v1774_v18 = vpack.c.bf16 %v380_v12, %v372_v11  ;;  %v863_v11 = vld [vmem:[#allocation11 + $0x218] sm:$0xff]  ;;  %v797_v12 = vld [vmem:[#allocation11 + $0x8] sm:$0xff] }
 0x184   :  { %1697 = vmatprep.subr.bf16.mxu0 %v1696_v23  ;;  %v388_v23 = vld [vmem:[#allocation10 + $0x1b0] sm:$0xff]  ;;  %v1796_v19 = vpack.c.bf16 %v799_v13, %v797_v12  ;;  %v880_v12 = vld [vmem:[#allocation11 + $0x2a0] sm:$0xff] }
 0x185   :  { %v882_v13 = vld [vmem:[#allocation11 + $0x2b0] sm:$0xff] }
 0x187   :  { %1699 = vmatpush1.bf16.msra.mxu0 %v1698_v31  ;;  %v410_v31 = vld [vmem:[#allocation10 + $0x260] sm:$0xff] }
 0x188   :  { %1733 = vmatprep.subr.bf16.mxu0 %v1732_v36  ;;  %v419_v36 = vld [vmem:[#allocation10 + $0x2a8] sm:$0xff] }
 0x194   :  { %v323_v41 = vpop.f32.mrb[2].mxu1 }
 0x195   :  { %v2506_v42 = vadd.f32 %v1479_v24, %v323_v41  ;;  %v1619_v43 = vpop.f32.mrb[3].mxu1  ;;  %v449_v24 = vld [vmem:[#allocation10 + $0x398] sm:$0xff] }
 0x196   :  { %v1728_v27 = vpack.c.bf16 %v457_v25, %v449_v24  ;;  %v396_v24 = vld [vmem:[#allocation10 + $0x1f0] sm:$0xff]  ;;  %v403_v25 = vld [vmem:[#allocation10 + $0x228] sm:$0xff] }
 0x197   :  { %v327_v46 = vmul.f32 %v2506_v42, %v2506_v42  ;;  %v1748_v32 = vpack.c.bf16 %v411_v26, %v403_v25  ;;  %v803_v25 = vld [vmem:[#allocation11 + $0x38] sm:$0xff] }
 0x198   :  { %1729 = vmatprep.subr.bf16.mxu1 %v1728_v27  ;;  %v405_v27 = vld [vmem:[#allocation10 + $0x238] sm:$0xff] }
 0x199   :  { %328 = vadd.xlane.f32.xlu0 %v327_v46  ;;  %1731 = vmatpush1.bf16.msra.mxu1 %v1730_v35  ;;  %v346_v46 = vld [vmem:[#allocation10 + $0x60] sm:$0xff]  ;;  %v1780_v33 = vpack.c.bf16 %v413_v28, %v405_v27  ;;  %v412_v35 = vld [vmem:[#allocation10 + $0x270] sm:$0xff] }
 0x19a   :  { %1765 = vmatprep.subr.bf16.mxu1 %v1764_v38  ;;  %v1734_v57 = vpack.c.bf16 %v346_v46, %v338_v45  ;;  %v421_v38 = vld [vmem:[#allocation10 + $0x2b8] sm:$0xff]  ;;  %v1752_v45 = vpack.c.bf16 %v427_v37, %v419_v36  ;;  %v864_v28 = vld [vmem:[#allocation11 + $0x220] sm:$0xff] }
 0x19b   :  { %v807_v36 = vld [vmem:[#allocation11 + $0x58] sm:$0xff] }
 0x206   :  { %v229_v39 = vpop.xlane.xlu0 %228 }
 0x207   :  { %v230_v40 = vmax.f32 %v229_v39, 1e-24  ;;  %v429_v39 = vld [vmem:[#allocation10 + $0x2f8] sm:$0xff] }
 0x208   :  { %v1784_v46 = vpack.c.bf16 %v429_v39, %v421_v38  ;;  %v868_v39 = vld [vmem:[#allocation11 + $0x240] sm:$0xff] }
 0x209   :  { %2109 = vrsqrt.f32 %v230_v40  ;;  %v1750_v40 = vpack.c.bf16 %v410_v31, %v402_v30  ;;  %v800_v31 = vld [vmem:[#allocation11 + $0x20] sm:$0xff] }
 0x213   :  { %v2110_v44 = vpop.eup %2109 }
 0x214   :  { %v232_v55 = vmul.f32 %v2110_v44, %v2499_v54  ;;  %v1738_v54 = vpack.c.bf16 %v362_v60, %v354_v59  ;;  %v426_v44 = vld [vmem:[#allocation10 + $0x2e0] sm:$0xff]  ;;  %v1788_v59 = vpack.c.bf16 %v445_v52, %v437_v51  ;;  %v436_v60 = vld [vmem:[#allocation10 + $0x330] sm:$0xff] }
 0x215   :  { %v872_v51 = vld [vmem:[#allocation11 + $0x260] sm:$0xff]  ;;  %v874_v52 = vld [vmem:[#allocation11 + $0x270] sm:$0xff] }
 0x226   :  { %v329_v41 = vpop.xlane.xlu0 %328 }
 0x227   :  { %v330_v43 = vmax.f32 %v329_v41, 1e-24  ;;  %v1782_v41 = vpack.c.bf16 %v412_v35, %v404_v34  ;;  %v871_v34 = vld [vmem:[#allocation11 + $0x258] sm:$0xff]  ;;  %v805_v35 = vld [vmem:[#allocation11 + $0x48] sm:$0xff] }
 0x229   :  { %2111 = vrsqrt.f32 %v330_v43  ;;  %v418_v43 = vld [vmem:[#allocation10 + $0x2a0] sm:$0xff] }
 0x22a   :  { %v1754_v53 = vpack.c.bf16 %v426_v44, %v418_v43  ;;  %v1804_v43 = vpack.c.bf16 %v807_v36, %v805_v35  ;;  %v804_v44 = vld [vmem:[#allocation11 + $0x40] sm:$0xff]  ;;  %v890_v36 = vld [vmem:[#allocation11 + $0x2f0] sm:$0xff] }
 0x22b   :  { %v888_v35 = vld [vmem:[#allocation11 + $0x2e0] sm:$0xff] }
 0x233   :  { %v2112_v50 = vpop.eup %2111 }
 0x234   :  { %v332_v56 = vmul.f32 %v2112_v50, %v2506_v42  ;;  %v1770_v42 = vpack.c.bf16 %v364_v2, %v356_v0  ;;  %v443_v50 = vld [vmem:[#allocation10 + $0x368] sm:$0xff]  ;;  %v453_v2 = vld [vmem:[#allocation10 + $0x3b8] sm:$0xff] }
 0x235   :  { %v459_v0 = vld [vmem:[#allocation10 + $0x3e8] sm:$0xff]  ;;  %v1792_v7 = vpack.c.bf16 %v461_v3, %v453_v2  ;;  %v876_v2 = vld [vmem:[#allocation11 + $0x280] sm:$0xff]  ;;  %v878_v3 = vld [vmem:[#allocation11 + $0x290] sm:$0xff] }
 0x236   :  { %v2512_v61 = vadd.f32 %v332_v56, %v232_v55  ;;  %v1786_v55 = vpack.c.bf16 %v428_v48, %v420_v47  ;;  %v434_v56 = vld [vmem:[#allocation10 + $0x320] sm:$0xff]  ;;  %v875_v47 = vld [vmem:[#allocation11 + $0x278] sm:$0xff]  ;;  %v809_v48 = vld [vmem:[#allocation11 + $0x68] sm:$0xff] }
 0x238   :  { %569 = vmatmul.mubr.f32.vlgmr.msra.gmra.mrb[0].mxu0 %v2512_v61  ;;  %640 = vmatmul.mubr.f32.vlgmr.msra.gmra.mrb[4].mxu1 %v2512_v61 }
 0x239   :  { %1735 = vmatpush1.bf16.msra.mxu0 %v1734_v57  ;;  %1767 = vmatpush1.bf16.msra.mxu1 %v1766_v58  ;;  %v442_v57 = vld [vmem:[#allocation10 + $0x360] sm:$0xff]  ;;  %v1756_v58 = vpack.c.bf16 %v443_v50, %v435_v49  ;;  %v811_v49 = vld [vmem:[#allocation11 + $0x78] sm:$0xff] }
 0x23a   :  { %1737 = vmatprep.subr.bf16.mxu0 %v1736_v62  ;;  %1769 = vmatprep.subr.bf16.mxu1 %v1768_v63  ;;  %v444_v62 = vld [vmem:[#allocation10 + $0x370] sm:$0xff]  ;;  %v451_v63 = vld [vmem:[#allocation10 + $0x3a8] sm:$0xff]  ;;  %v1758_v4 = vpack.c.bf16 %v442_v57, %v434_v56  ;;  %v808_v56 = vld [vmem:[#allocation11 + $0x60] sm:$0xff] }
 0x23b   :  { %710 = vmatprep.mubr.f32.mxu0 %v2314_v1  ;;  %781 = vmatprep.mubr.f32.mxu1 %v2314_v1  ;;  %v1778_v1 = vpack.c.bf16 %v396_v24, %v388_v23  ;;  %v1790_v5 = vpack.c.bf16 %v444_v62, %v436_v60  ;;  %v867_v23 = vld [vmem:[#allocation11 + $0x238] sm:$0xff]  ;;  %v801_v24 = vld [vmem:[#allocation11 + $0x28] sm:$0xff]  ;;  %v810_v57 = vld [vmem:[#allocation11 + $0x70] sm:$0xff] }
 0x23c   :  { %v1800_v30 = vpack.c.bf16 %v803_v25, %v801_v24  ;;  %v813_v60 = vld [vmem:[#allocation11 + $0x88] sm:$0xff]  ;;  %v815_v62 = vld [vmem:[#allocation11 + $0x98] sm:$0xff]  ;;  %v884_v24 = vld [vmem:[#allocation11 + $0x2c0] sm:$0xff] }
 0x23d   :  { %1739 = vmatpush1.bf16.msra.mxu0 %v1738_v54  ;;  %1771 = vmatpush1.bf16.msra.mxu1 %v1770_v42  ;;  %v458_v54 = vld [vmem:[#allocation10 + $0x3e0] sm:$0xff]  ;;  %v1760_v42 = vpack.c.bf16 %v459_v0, %v451_v63  ;;  %v1874_v63 = vpack.c.bf16 %v874_v52, %v872_v51  ;;  %v1810_v0 = vpack.c.bf16 %v810_v57, %v808_v56  ;;  %v886_v25 = vld [vmem:[#allocation11 + $0x2d0] sm:$0xff]  ;;  %v833_v56 = vld [vmem:[#allocation11 + $0x128] sm:$0xff] }
 0x23e   :  { %1741 = vmatprep.subr.bf16.mxu0 %v1740_v9  ;;  %1773 = vmatprep.subr.bf16.mxu1 %v1772_v10  ;;  %v460_v9 = vld [vmem:[#allocation10 + $0x3f0] sm:$0xff]  ;;  %v861_v10 = vld [vmem:[#allocation11 + $0x208] sm:$0xff]  ;;  %v1762_v14 = vpack.c.bf16 %v458_v54, %v450_v6  ;;  %v812_v6 = vld [vmem:[#allocation11 + $0x80] sm:$0xff] }
 0x23f   :  { %v1794_v15 = vpack.c.bf16 %v460_v9, %v452_v8  ;;  %v814_v54 = vld [vmem:[#allocation11 + $0x90] sm:$0xff]  ;;  %v817_v8 = vld [vmem:[#allocation11 + $0xa8] sm:$0xff]  ;;  %v819_v9 = vld [vmem:[#allocation11 + $0xb8] sm:$0xff] }
 0x240   :  { %v828_v51 = vld [vmem:[#allocation11 + $0x100] sm:$0xff]  ;;  %v830_v52 = vld [vmem:[#allocation11 + $0x110] sm:$0xff]  ;;  %v835_v57 = vld [vmem:[#allocation11 + $0x138] sm:$0xff] }
 0x241   :  { %1743 = vmatpush1.bf16.msra.mxu0 %v1742_v17  ;;  %1775 = vmatpush1.bf16.msra.mxu1 %v1774_v18  ;;  %v862_v17 = vld [vmem:[#allocation11 + $0x210] sm:$0xff]  ;;  %v1860_v18 = vpack.c.bf16 %v863_v11, %v861_v10  ;;  %v1878_v10 = vpack.c.bf16 %v878_v3, %v876_v2  ;;  %v1814_v11 = vpack.c.bf16 %v814_v54, %v812_v6  ;;  %v832_v2 = vld [vmem:[#allocation11 + $0x120] sm:$0xff]  ;;  %v837_v6 = vld [vmem:[#allocation11 + $0x148] sm:$0xff] }
 0x242   :  { %1745 = vmatprep.subr.bf16.mxu0 %v1744_v21  ;;  %1777 = vmatprep.subr.bf16.mxu1 %v1776_v22  ;;  %v798_v21 = vld [vmem:[#allocation11 + $0x10] sm:$0xff]  ;;  %v865_v22 = vld [vmem:[#allocation11 + $0x228] sm:$0xff]  ;;  %v1862_v26 = vpack.c.bf16 %v862_v17, %v860_v16  ;;  %v816_v16 = vld [vmem:[#allocation11 + $0xa0] sm:$0xff] }
 0x243   :  { %v1798_v27 = vpack.c.bf16 %v798_v21, %v796_v20  ;;  %v818_v17 = vld [vmem:[#allocation11 + $0xb0] sm:$0xff]  ;;  %v821_v20 = vld [vmem:[#allocation11 + $0xc8] sm:$0xff]  ;;  %v823_v21 = vld [vmem:[#allocation11 + $0xd8] sm:$0xff] }
 0x244   :  { %v834_v3 = vld [vmem:[#allocation11 + $0x130] sm:$0xff]  ;;  %v839_v54 = vld [vmem:[#allocation11 + $0x158] sm:$0xff] }
 0x245   :  { %1747 = vmatpush1.bf16.msra.mxu0 %v1746_v29  ;;  %1779 = vmatpush1.bf16.msra.mxu1 %v1778_v1  ;;  %v866_v29 = vld [vmem:[#allocation11 + $0x230] sm:$0xff]  ;;  %v1864_v1 = vpack.c.bf16 %v867_v23, %v865_v22  ;;  %v1882_v22 = vpack.c.bf16 %v882_v13, %v880_v12  ;;  %v1818_v23 = vpack.c.bf16 %v818_v17, %v816_v16  ;;  %v836_v12 = vld [vmem:[#allocation11 + $0x140] sm:$0xff]  ;;  %v841_v16 = vld [vmem:[#allocation11 + $0x168] sm:$0xff] }
 0x246   :  { %1749 = vmatprep.subr.bf16.mxu0 %v1748_v32  ;;  %1781 = vmatprep.subr.bf16.mxu1 %v1780_v33  ;;  %v802_v32 = vld [vmem:[#allocation11 + $0x30] sm:$0xff]  ;;  %v869_v33 = vld [vmem:[#allocation11 + $0x248] sm:$0xff]  ;;  %v1866_v37 = vpack.c.bf16 %v866_v29, %v864_v28  ;;  %v820_v28 = vld [vmem:[#allocation11 + $0xc0] sm:$0xff] }
 0x247   :  { %v1802_v38 = vpack.c.bf16 %v802_v32, %v800_v31  ;;  %v822_v29 = vld [vmem:[#allocation11 + $0xd0] sm:$0xff]  ;;  %v825_v31 = vld [vmem:[#allocation11 + $0xe8] sm:$0xff]  ;;  %v827_v32 = vld [vmem:[#allocation11 + $0xf8] sm:$0xff] }
 0x248   :  { %v838_v13 = vld [vmem:[#allocation11 + $0x150] sm:$0xff]  ;;  %v843_v17 = vld [vmem:[#allocation11 + $0x178] sm:$0xff] }
 0x249   :  { %1751 = vmatpush1.bf16.msra.mxu0 %v1750_v40  ;;  %1783 = vmatpush1.bf16.msra.mxu1 %v1782_v41  ;;  %v870_v40 = vld [vmem:[#allocation11 + $0x250] sm:$0xff]  ;;  %v1868_v41 = vpack.c.bf16 %v871_v34, %v869_v33  ;;  %v1886_v33 = vpack.c.bf16 %v886_v25, %v884_v24  ;;  %v1822_v34 = vpack.c.bf16 %v822_v29, %v820_v28  ;;  %v840_v24 = vld [vmem:[#allocation11 + $0x160] sm:$0xff]  ;;  %v845_v28 = vld [vmem:[#allocation11 + $0x188] sm:$0xff] }
 0x24a   :  { %1753 = vmatprep.subr.bf16.mxu0 %v1752_v45  ;;  %1785 = vmatprep.subr.bf16.mxu1 %v1784_v46  ;;  %v806_v45 = vld [vmem:[#allocation11 + $0x50] sm:$0xff]  ;;  %v873_v46 = vld [vmem:[#allocation11 + $0x268] sm:$0xff]  ;;  %v1870_v50 = vpack.c.bf16 %v870_v40, %v868_v39  ;;  %v824_v39 = vld [vmem:[#allocation11 + $0xe0] sm:$0xff] }
 0x24b   :  { %v826_v40 = vld [vmem:[#allocation11 + $0xf0] sm:$0xff]  ;;  %v847_v29 = vld [vmem:[#allocation11 + $0x198] sm:$0xff] }
 0x24c   :  { %v842_v25 = vld [vmem:[#allocation11 + $0x170] sm:$0xff] }
 0x24d   :  { %1755 = vmatpush1.bf16.msra.mxu0 %v1754_v53  ;;  %1787 = vmatpush1.bf16.msra.mxu1 %v1786_v55  ;;  %v1872_v53 = vpack.c.bf16 %v875_v47, %v873_v46  ;;  %v1808_v55 = vpack.c.bf16 %v811_v49, %v809_v48  ;;  %v1890_v46 = vpack.c.bf16 %v890_v36, %v888_v35  ;;  %v892_v48 = vld [vmem:[#allocation11 + $0x300] sm:$0xff]  ;;  %v894_v49 = vld [vmem:[#allocation11 + $0x310] sm:$0xff] }
 0x24e   :  { %1757 = vmatprep.subr.bf16.mxu0 %v1756_v58  ;;  %1789 = vmatprep.subr.bf16.mxu1 %v1788_v59  ;;  %v877_v58 = vld [vmem:[#allocation11 + $0x288] sm:$0xff]  ;;  %v879_v59 = vld [vmem:[#allocation11 + $0x298] sm:$0xff]  ;;  %v1826_v47 = vpack.c.bf16 %v826_v40, %v824_v39  ;;  %v844_v35 = vld [vmem:[#allocation11 + $0x180] sm:$0xff] }
 0x24f   :  { %v846_v36 = vld [vmem:[#allocation11 + $0x190] sm:$0xff]  ;;  %v849_v39 = vld [vmem:[#allocation11 + $0x1a8] sm:$0xff]  ;;  %v851_v40 = vld [vmem:[#allocation11 + $0x1b8] sm:$0xff] }
 0x251   :  { %1759 = vmatpush1.bf16.msra.mxu0 %v1758_v4  ;;  %1791 = vmatpush1.bf16.msra.mxu1 %v1790_v5  ;;  %v1876_v4 = vpack.c.bf16 %v879_v59, %v877_v58  ;;  %v1812_v5 = vpack.c.bf16 %v815_v62, %v813_v60  ;;  %v1894_v58 = vpack.c.bf16 %v894_v49, %v892_v48  ;;  %v896_v60 = vld [vmem:[#allocation11 + $0x320] sm:$0xff]  ;;  %v898_v62 = vld [vmem:[#allocation11 + $0x330] sm:$0xff] }
 0x252   :  { %1761 = vmatprep.subr.bf16.mxu0 %v1760_v42  ;;  %1793 = vmatprep.subr.bf16.mxu1 %v1792_v7  ;;  %v881_v42 = vld [vmem:[#allocation11 + $0x2a8] sm:$0xff]  ;;  %v883_v7 = vld [vmem:[#allocation11 + $0x2b8] sm:$0xff]  ;;  %v1830_v59 = vpack.c.bf16 %v830_v52, %v828_v51  ;;  %v848_v48 = vld [vmem:[#allocation11 + $0x1a0] sm:$0xff] }
 0x253   :  { %v850_v49 = vld [vmem:[#allocation11 + $0x1b0] sm:$0xff]  ;;  %v853_v51 = vld [vmem:[#allocation11 + $0x1c8] sm:$0xff]  ;;  %v855_v52 = vld [vmem:[#allocation11 + $0x1d8] sm:$0xff] }
 0x255   :  { %1763 = vmatpush1.bf16.msra.mxu0 %v1762_v14  ;;  %1795 = vmatpush1.bf16.msra.mxu1 %v1794_v15  ;;  %v1880_v14 = vpack.c.bf16 %v883_v7, %v881_v42  ;;  %v1816_v15 = vpack.c.bf16 %v819_v9, %v817_v8  ;;  %v1898_v42 = vpack.c.bf16 %v898_v62, %v896_v60  ;;  %v900_v8 = vld [vmem:[#allocation11 + $0x340] sm:$0xff]  ;;  %v902_v9 = vld [vmem:[#allocation11 + $0x350] sm:$0xff] }
 0x256   :  { %1861 = vmatprep.subr.bf16.mxu0 %v1860_v18  ;;  %1797 = vmatprep.subr.bf16.mxu1 %v1796_v19  ;;  %v885_v18 = vld [vmem:[#allocation11 + $0x2c8] sm:$0xff]  ;;  %v887_v19 = vld [vmem:[#allocation11 + $0x2d8] sm:$0xff]  ;;  %v1834_v7 = vpack.c.bf16 %v834_v3, %v832_v2  ;;  %v852_v60 = vld [vmem:[#allocation11 + $0x1c0] sm:$0xff] }
 0x257   :  { %v854_v62 = vld [vmem:[#allocation11 + $0x1d0] sm:$0xff]  ;;  %v857_v2 = vld [vmem:[#allocation11 + $0x1e8] sm:$0xff]  ;;  %v859_v3 = vld [vmem:[#allocation11 + $0x1f8] sm:$0xff] }
 0x258   :  { %711 = vmatmul.mubr.f32.vlgmr.msra.gmra.mrb[2].mxu0 %v2512_v61  ;;  %782 = vmatmul.mubr.f32.vlgmr.msra.gmra.mrb[6].mxu1 %v2512_v61  ;;  %v1806_v61 = vpack.c.bf16 %v806_v45, %v804_v44  ;;  %v829_v44 = vld [vmem:[#allocation11 + $0x108] sm:$0xff]  ;;  %v831_v45 = vld [vmem:[#allocation11 + $0x118] sm:$0xff] }
 0x259   :  { %1863 = vmatpush1.bf16.msra.mxu0 %v1862_v26  ;;  %1799 = vmatpush1.bf16.msra.mxu1 %v1798_v27  ;;  %v1884_v26 = vpack.c.bf16 %v887_v19, %v885_v18  ;;  %v1820_v27 = vpack.c.bf16 %v823_v21, %v821_v20  ;;  %v1902_v18 = vpack.c.bf16 %v902_v9, %v900_v8  ;;  %v904_v20 = vld [vmem:[#allocation11 + $0x360] sm:$0xff]  ;;  %v906_v21 = vld [vmem:[#allocation11 + $0x370] sm:$0xff] }
 0x25a   :  { %1865 = vmatprep.subr.bf16.mxu0 %v1864_v1  ;;  %1801 = vmatprep.subr.bf16.mxu1 %v1800_v30  ;;  %v889_v1 = vld [vmem:[#allocation11 + $0x2e8] sm:$0xff]  ;;  %v891_v30 = vld [vmem:[#allocation11 + $0x2f8] sm:$0xff]  ;;  %v1838_v19 = vpack.c.bf16 %v838_v13, %v836_v12  ;;  %v856_v8 = vld [vmem:[#allocation11 + $0x1e0] sm:$0xff] }
 0x25b   :  { %v858_v9 = vld [vmem:[#allocation11 + $0x1f0] sm:$0xff] }
 0x25c   :  { %v1858_v13 = vpack.c.bf16 %v858_v9, %v856_v8 }
 0x25d   :  { %1867 = vmatpush1.bf16.msra.mxu0 %v1866_v37  ;;  %1803 = vmatpush1.bf16.msra.mxu1 %v1802_v38  ;;  %v1888_v37 = vpack.c.bf16 %v891_v30, %v889_v1  ;;  %v1824_v38 = vpack.c.bf16 %v827_v32, %v825_v31  ;;  %v1906_v1 = vpack.c.bf16 %v906_v21, %v904_v20  ;;  %v908_v31 = vld [vmem:[#allocation11 + $0x380] sm:$0xff]  ;;  %v910_v32 = vld [vmem:[#allocation11 + $0x390] sm:$0xff] }
 0x25e   :  { %1869 = vmatprep.subr.bf16.mxu0 %v1868_v41  ;;  %1805 = vmatprep.subr.bf16.mxu1 %v1804_v43  ;;  %v893_v41 = vld [vmem:[#allocation11 + $0x308] sm:$0xff]  ;;  %v895_v43 = vld [vmem:[#allocation11 + $0x318] sm:$0xff]  ;;  %v1842_v30 = vpack.c.bf16 %v842_v25, %v840_v24 }
 0x261   :  { %1871 = vmatpush1.bf16.msra.mxu0 %v1870_v50  ;;  %1807 = vmatpush1.bf16.msra.mxu1 %v1806_v61  ;;  %v1892_v50 = vpack.c.bf16 %v895_v43, %v893_v41  ;;  %v1828_v61 = vpack.c.bf16 %v831_v45, %v829_v44  ;;  %v1910_v41 = vpack.c.bf16 %v910_v32, %v908_v31  ;;  %v912_v44 = vld [vmem:[#allocation11 + $0x3a0] sm:$0xff]  ;;  %v914_v45 = vld [vmem:[#allocation11 + $0x3b0] sm:$0xff] }
 0x262   :  { %1873 = vmatprep.subr.bf16.mxu0 %v1872_v53  ;;  %1809 = vmatprep.subr.bf16.mxu1 %v1808_v55  ;;  %v897_v53 = vld [vmem:[#allocation11 + $0x328] sm:$0xff]  ;;  %v899_v55 = vld [vmem:[#allocation11 + $0x338] sm:$0xff]  ;;  %v1846_v43 = vpack.c.bf16 %v846_v36, %v844_v35  ;;  %v924_v31 = vld [vmem:[#allocation11 + $0x400] sm:$0xff] }
 0x263   :  { %v926_v32 = vld [vmem:[#allocation11 + $0x410] sm:$0xff]  ;;  %v929_v35 = vld [vmem:[#allocation11 + $0x428] sm:$0xff]  ;;  %v931_v36 = vld [vmem:[#allocation11 + $0x438] sm:$0xff] }
 0x265   :  { %1875 = vmatpush1.bf16.msra.mxu0 %v1874_v63  ;;  %1811 = vmatpush1.bf16.msra.mxu1 %v1810_v0  ;;  %v1896_v63 = vpack.c.bf16 %v899_v55, %v897_v53  ;;  %v1832_v0 = vpack.c.bf16 %v835_v57, %v833_v56  ;;  %v1914_v53 = vpack.c.bf16 %v914_v45, %v912_v44  ;;  %v916_v56 = vld [vmem:[#allocation11 + $0x3c0] sm:$0xff]  ;;  %v930_v45 = vld [vmem:[#allocation11 + $0x430] sm:$0xff] }
 0x266   :  { %1877 = vmatprep.subr.bf16.mxu0 %v1876_v4  ;;  %1813 = vmatprep.subr.bf16.mxu1 %v1812_v5  ;;  %v901_v4 = vld [vmem:[#allocation11 + $0x348] sm:$0xff]  ;;  %v903_v5 = vld [vmem:[#allocation11 + $0x358] sm:$0xff]  ;;  %v1850_v55 = vpack.c.bf16 %v850_v49, %v848_v48  ;;  %v928_v44 = vld [vmem:[#allocation11 + $0x420] sm:$0xff] }
 0x267   :  { %v1930_v48 = vpack.c.bf16 %v930_v45, %v928_v44 }
 0x269   :  { %1879 = vmatpush1.bf16.msra.mxu0 %v1878_v10  ;;  %1815 = vmatpush1.bf16.msra.mxu1 %v1814_v11  ;;  %v1900_v10 = vpack.c.bf16 %v903_v5, %v901_v4  ;;  %v1836_v11 = vpack.c.bf16 %v839_v54, %v837_v6  ;;  %v1854_v5 = vpack.c.bf16 %v854_v62, %v852_v60  ;;  %v920_v6 = vld [vmem:[#allocation11 + $0x3e0] sm:$0xff] }
 0x26a   :  { %1881 = vmatprep.subr.bf16.mxu0 %v1880_v14  ;;  %1817 = vmatprep.subr.bf16.mxu1 %v1816_v15  ;;  %v905_v14 = vld [vmem:[#allocation11 + $0x368] sm:$0xff]  ;;  %v907_v15 = vld [vmem:[#allocation11 + $0x378] sm:$0xff] }
 0x26d   :  { %1883 = vmatpush1.bf16.msra.mxu0 %v1882_v22  ;;  %1819 = vmatpush1.bf16.msra.mxu1 %v1818_v23  ;;  %v1904_v22 = vpack.c.bf16 %v907_v15, %v905_v14  ;;  %v1840_v23 = vpack.c.bf16 %v843_v17, %v841_v16  ;;  %v464_v15 = vlaneseq }
 0x26e   :  { %1885 = vmatprep.subr.bf16.mxu0 %v1884_v26  ;;  %1821 = vmatprep.subr.bf16.mxu1 %v1820_v27  ;;  %v909_v26 = vld [vmem:[#allocation11 + $0x388] sm:$0xff]  ;;  %v911_v27 = vld [vmem:[#allocation11 + $0x398] sm:$0xff] }
 0x26f   :  { %v2520_v16 = vshrl.u32 %v464_v15, 7 }
 0x271   :  { %1887 = vmatpush1.bf16.msra.mxu0 %v1886_v33  ;;  %1823 = vmatpush1.bf16.msra.mxu1 %v1822_v34  ;;  %v1908_v33 = vpack.c.bf16 %v911_v27, %v909_v26  ;;  %v1844_v34 = vpack.c.bf16 %v847_v29, %v845_v28  ;;  %v466_v17 = vsub.s32 0, %v2520_v16  ;;  %v470_v20 = vsub.s32 1, %v2520_v16 }
 0x272   :  { %1889 = vmatprep.subr.bf16.mxu0 %v1888_v37  ;;  %1825 = vmatprep.subr.bf16.mxu1 %v1824_v38  ;;  %v913_v37 = vld [vmem:[#allocation11 + $0x3a8] sm:$0xff]  ;;  %v915_v38 = vld [vmem:[#allocation11 + $0x3b8] sm:$0xff]  ;;  %v478_v21 = vsub.s32 3, %v2520_v16 }
 0x275   :  { %1891 = vmatpush1.bf16.msra.mxu0 %v1890_v46  ;;  %1827 = vmatpush1.bf16.msra.mxu1 %v1826_v47  ;;  %v1912_v46 = vpack.c.bf16 %v915_v38, %v913_v37  ;;  %v1848_v47 = vpack.c.bf16 %v851_v40, %v849_v39  ;;  %v1926_v39 = vpack.c.bf16 %v926_v32, %v924_v31  ;;  %v956_v31 = vld [vmem:[#allocation11 + $0x500] sm:$0xff]  ;;  %v958_v32 = vld [vmem:[#allocation11 + $0x510] sm:$0xff] }
 0x276   :  { %1893 = vmatprep.subr.bf16.mxu0 %v1892_v50  ;;  %1829 = vmatprep.subr.bf16.mxu1 %v1828_v61  ;;  %v917_v50 = vld [vmem:[#allocation11 + $0x3c8] sm:$0xff]  ;;  %v919_v61 = vld [vmem:[#allocation11 + $0x3d8] sm:$0xff] }
 0x277   :  { %v1916_v57 = vpack.c.bf16 %v919_v61, %v917_v50  ;;  %v932_v50 = vld [vmem:[#allocation11 + $0x440] sm:$0xff]  ;;  %v934_v61 = vld [vmem:[#allocation11 + $0x450] sm:$0xff] }
 0x279   :  { %1895 = vmatpush1.bf16.msra.mxu0 %v1894_v58  ;;  %1831 = vmatpush1.bf16.msra.mxu1 %v1830_v59  ;;  %v1852_v58 = vpack.c.bf16 %v855_v52, %v853_v51  ;;  %v918_v59 = vld [vmem:[#allocation11 + $0x3d0] sm:$0xff]  ;;  %v937_v51 = vld [vmem:[#allocation11 + $0x468] sm:$0xff]  ;;  %v939_v52 = vld [vmem:[#allocation11 + $0x478] sm:$0xff] }
 0x27a   :  { %1897 = vmatprep.subr.bf16.mxu0 %v1896_v63  ;;  %1833 = vmatprep.subr.bf16.mxu1 %v1832_v0  ;;  %v921_v63 = vld [vmem:[#allocation11 + $0x3e8] sm:$0xff]  ;;  %v923_v0 = vld [vmem:[#allocation11 + $0x3f8] sm:$0xff]  ;;  %v1918_v4 = vpack.c.bf16 %v918_v59, %v916_v56  ;;  %v936_v56 = vld [vmem:[#allocation11 + $0x460] sm:$0xff] }
 0x27b   :  { %v1920_v54 = vpack.c.bf16 %v923_v0, %v921_v63  ;;  %v943_v59 = vld [vmem:[#allocation11 + $0x498] sm:$0xff]  ;;  %v940_v63 = vld [vmem:[#allocation11 + $0x480] sm:$0xff]  ;;  %v942_v0 = vld [vmem:[#allocation11 + $0x490] sm:$0xff] }
 0x27d   :  { %1899 = vmatpush1.bf16.msra.mxu0 %v1898_v42  ;;  %1835 = vmatpush1.bf16.msra.mxu1 %v1834_v7  ;;  %v1856_v42 = vpack.c.bf16 %v859_v3, %v857_v2  ;;  %v922_v7 = vld [vmem:[#allocation11 + $0x3f0] sm:$0xff]  ;;  %v945_v2 = vld [vmem:[#allocation11 + $0x4a8] sm:$0xff]  ;;  %v947_v3 = vld [vmem:[#allocation11 + $0x4b8] sm:$0xff] }
 0x27e   :  { %1901 = vmatprep.subr.bf16.mxu0 %v1900_v10  ;;  %1837 = vmatprep.subr.bf16.mxu1 %v1836_v11  ;;  %v925_v10 = vld [vmem:[#allocation11 + $0x408] sm:$0xff]  ;;  %v927_v11 = vld [vmem:[#allocation11 + $0x418] sm:$0xff]  ;;  %v1922_v12 = vpack.c.bf16 %v922_v7, %v920_v6  ;;  %v944_v6 = vld [vmem:[#allocation11 + $0x4a0] sm:$0xff] }
 0x27f   :  { %v1924_v14 = vpack.c.bf16 %v927_v11, %v925_v10  ;;  %v951_v7 = vld [vmem:[#allocation11 + $0x4d8] sm:$0xff]  ;;  %v948_v10 = vld [vmem:[#allocation11 + $0x4c0] sm:$0xff]  ;;  %v950_v11 = vld [vmem:[#allocation11 + $0x4d0] sm:$0xff] }
 0x280   :  { %v1950_v15 = vpack.c.bf16 %v950_v11, %v948_v10  ;;  %v985_v10 = vld [vmem:[#allocation11 + $0x5e8] sm:$0xff]  ;;  %v987_v11 = vld [vmem:[#allocation11 + $0x5f8] sm:$0xff] }
 0x281   :  { %1903 = vmatpush1.bf16.msra.mxu0 %v1902_v18  ;;  %1839 = vmatpush1.bf16.msra.mxu1 %v1838_v19  ;;  %v474_v18 = vsub.s32 2, %v2520_v16  ;;  %v2527_v19 = vld [vmem:[%s2585_s7] sm:$0xff] }
 0x282   :  { %1905 = vmatprep.subr.bf16.mxu0 %v1904_v22  ;;  %1841 = vmatprep.subr.bf16.mxu1 %v1840_v23  ;;  %v467_v22 = vrot.slane %v2527_v19, %v466_v17  ;;  %v471_v24 = vrot.slane %v2527_v19, %v470_v20  ;;  %v479_v25 = vrot.slane %v2527_v19, %v478_v21  ;;  %v952_v21 = vld [vmem:[#allocation11 + $0x4e0] sm:$0xff] }
 0x283   :  { %v475_v23 = vrot.slane %v2527_v19, %v474_v18 }
 0x285   :  { %1907 = vmatpush1.bf16.msra.mxu0 %v1906_v1  ;;  %1843 = vmatpush1.bf16.msra.mxu1 %v1842_v30 }
 0x286   :  { %1909 = vmatprep.subr.bf16.mxu0 %v1908_v33  ;;  %1845 = vmatprep.subr.bf16.mxu1 %v1844_v34 }
 0x289   :  { %1911 = vmatpush1.bf16.msra.mxu0 %v1910_v41  ;;  %1847 = vmatpush1.bf16.msra.mxu1 %v1846_v43  ;;  %v1928_v43 = vpack.c.bf16 %v931_v36, %v929_v35  ;;  %v963_v35 = vld [vmem:[#allocation11 + $0x538] sm:$0xff] }
 0x28a   :  { %1913 = vmatprep.subr.bf16.mxu0 %v1912_v46  ;;  %1849 = vmatprep.subr.bf16.mxu1 %v1848_v47  ;;  %v933_v46 = vld [vmem:[#allocation11 + $0x448] sm:$0xff]  ;;  %v935_v47 = vld [vmem:[#allocation11 + $0x458] sm:$0xff] }
 0x28b   :  { %v1932_v49 = vpack.c.bf16 %v935_v47, %v933_v46  ;;  %v964_v46 = vld [vmem:[#allocation11 + $0x540] sm:$0xff]  ;;  %v966_v47 = vld [vmem:[#allocation11 + $0x550] sm:$0xff] }
 0x28d   :  { %1915 = vmatpush1.bf16.msra.mxu0 %v1914_v53  ;;  %1851 = vmatpush1.bf16.msra.mxu1 %v1850_v55  ;;  %v1934_v53 = vpack.c.bf16 %v934_v61, %v932_v50  ;;  %v1936_v55 = vpack.c.bf16 %v939_v52, %v937_v51  ;;  %v1966_v50 = vpack.c.bf16 %v966_v47, %v964_v46  ;;  %v968_v51 = vld [vmem:[#allocation11 + $0x560] sm:$0xff]  ;;  %v970_v52 = vld [vmem:[#allocation11 + $0x570] sm:$0xff]  ;;  %v1003_v46 = vld [vmem:[#allocation11 + $0x678] sm:$0xff] }
 0x28e   :  { %1917 = vmatprep.subr.bf16.mxu0 %v1916_v57  ;;  %1853 = vmatprep.subr.bf16.mxu1 %v1852_v58  ;;  %v938_v57 = vld [vmem:[#allocation11 + $0x470] sm:$0xff]  ;;  %v941_v58 = vld [vmem:[#allocation11 + $0x488] sm:$0xff] }
 0x28f   :  { %v1938_v60 = vpack.c.bf16 %v938_v57, %v936_v56  ;;  %v1940_v62 = vpack.c.bf16 %v943_v59, %v941_v58  ;;  %v1970_v56 = vpack.c.bf16 %v970_v52, %v968_v51  ;;  %v972_v58 = vld [vmem:[#allocation11 + $0x580] sm:$0xff]  ;;  %v974_v59 = vld [vmem:[#allocation11 + $0x590] sm:$0xff]  ;;  %v1007_v51 = vld [vmem:[#allocation11 + $0x698] sm:$0xff] }
 0x291   :  { %1919 = vmatpush1.bf16.msra.mxu0 %v1918_v4  ;;  %1855 = vmatpush1.bf16.msra.mxu1 %v1854_v5  ;;  %v1942_v4 = vpack.c.bf16 %v942_v0, %v940_v63  ;;  %v1944_v5 = vpack.c.bf16 %v947_v3, %v945_v2  ;;  %v1974_v63 = vpack.c.bf16 %v974_v59, %v972_v58  ;;  %v976_v2 = vld [vmem:[#allocation11 + $0x5a0] sm:$0xff]  ;;  %v978_v3 = vld [vmem:[#allocation11 + $0x5b0] sm:$0xff]  ;;  %v1011_v58 = vld [vmem:[#allocation11 + $0x6b8] sm:$0xff] }
 0x292   :  { %1921 = vmatprep.subr.bf16.mxu0 %v1920_v54  ;;  %1857 = vmatprep.subr.bf16.mxu1 %v1856_v42  ;;  %v946_v54 = vld [vmem:[#allocation11 + $0x4b0] sm:$0xff]  ;;  %v949_v42 = vld [vmem:[#allocation11 + $0x4c8] sm:$0xff] }
 0x293   :  { %v1946_v8 = vpack.c.bf16 %v946_v54, %v944_v6  ;;  %v1948_v9 = vpack.c.bf16 %v951_v7, %v949_v42  ;;  %v1978_v6 = vpack.c.bf16 %v978_v3, %v976_v2  ;;  %v482_v54 = vsub.s32 4, %v2520_v16  ;;  %v980_v7 = vld [vmem:[#allocation11 + $0x5c0] sm:$0xff]  ;;  %v1015_v2 = vld [vmem:[#allocation11 + $0x6d8] sm:$0xff] }
 0x295   :  { %1923 = vmatpush1.bf16.msra.mxu0 %v1922_v12  ;;  %1859 = vmatpush1.bf16.msra.mxu1 %v1858_v13  ;;  %v486_v12 = vsub.s32 5, %v2520_v16  ;;  %v953_v13 = vld [vmem:[#allocation11 + $0x4e8] sm:$0xff] }
 0x296   :  { %1925 = vmatprep.subr.bf16.mxu0 %v1924_v14  ;;  %v955_v14 = vld [vmem:[#allocation11 + $0x4f8] sm:$0xff] }
 0x297   :  { %v1952_v18 = vpack.c.bf16 %v955_v14, %v953_v13  ;;  %v483_v13 = vrot.slane %v2527_v19, %v482_v54  ;;  %v1984_v14 = vpack.c.bf16 %v987_v11, %v985_v10  ;;  %v1017_v54 = vld [vmem:[#allocation11 + $0x6e8] sm:$0xff]  ;;  %v1023_v11 = vld [vmem:[#allocation11 + $0x718] sm:$0xff] }
 0x298   :  { %v1021_v10 = vld [vmem:[#allocation11 + $0x708] sm:$0xff] }
 0x30b   :  { %v570_v26 = vpop.f32.mrb[0].mxu0  ;;  %v641_v27 = vpop.f32.mrb[4].mxu1 }
 0x30c   :  { %v571_v28 = vadd.f32 %v570_v26, %v467_v22  ;;  %v642_v29 = vadd.f32 %v641_v27, %v475_v23  ;;  %v572_v1 = vpop.f32.mrb[1].mxu0  ;;  %v643_v30 = vpop.f32.mrb[5].mxu1  ;;  %v954_v22 = vld [vmem:[#allocation11 + $0x4f0] sm:$0xff]  ;;  %v487_v23 = vrot.slane %v2527_v19, %v486_v12 }
 0x30d   :  { %v573_v33 = vadd.f32 %v572_v1, %v471_v24  ;;  %v644_v34 = vadd.f32 %v643_v30, %v479_v25  ;;  %v957_v24 = vld [vmem:[#allocation11 + $0x508] sm:$0xff]  ;;  %v959_v25 = vld [vmem:[#allocation11 + $0x518] sm:$0xff] }
 0x30e   :  { %v788_v40 = vmax.f32 %v571_v28, 0.0  ;;  %v790_v41 = vmax.f32 %v642_v29, 0.0  ;;  %v1954_v28 = vpack.c.bf16 %v954_v22, %v952_v21  ;;  %v1956_v30 = vpack.c.bf16 %v959_v25, %v957_v24  ;;  %v989_v22 = vld [vmem:[#allocation11 + $0x608] sm:$0xff] }
 0x30f   :  { %v789_v37 = vmax.f32 %v573_v33, 0.0  ;;  %v791_v38 = vmax.f32 %v644_v34, 0.0  ;;  %v961_v34 = vld [vmem:[#allocation11 + $0x528] sm:$0xff] }
 0x311   :  { %1128 = vmatprep.mubr.f32.mxu1 %v789_v37  ;;  %1199 = vmatprep.mubr.f32.mxu0 %v791_v38  ;;  %v1958_v37 = vpack.c.bf16 %v958_v32, %v956_v31  ;;  %v1960_v38 = vpack.c.bf16 %v963_v35, %v961_v34  ;;  %v993_v32 = vld [vmem:[#allocation11 + $0x628] sm:$0xff] }
 0x312   :  { %1129 = vmatmul.mubr.f32.vlgmr.msra.gmra.mrb[8].mxu1 %v788_v40  ;;  %1200 = vmatmul.mubr.f32.vlgmr.msra.gmra.mrb[4].mxu0 %v790_v41  ;;  %v962_v40 = vld [vmem:[#allocation11 + $0x530] sm:$0xff]  ;;  %v965_v41 = vld [vmem:[#allocation11 + $0x548] sm:$0xff] }
 0x313   :  { %1927 = vmatpush1.bf16.msra.mxu0 %v1926_v39  ;;  %v960_v39 = vld [vmem:[#allocation11 + $0x520] sm:$0xff] }
 0x314   :  { %1929 = vmatprep.subr.bf16.mxu0 %v1928_v43  ;;  %v967_v43 = vld [vmem:[#allocation11 + $0x558] sm:$0xff]  ;;  %v1962_v44 = vpack.c.bf16 %v962_v40, %v960_v39  ;;  %v997_v40 = vld [vmem:[#allocation11 + $0x648] sm:$0xff] }
 0x315   :  { %v1964_v45 = vpack.c.bf16 %v967_v43, %v965_v41  ;;  %v999_v41 = vld [vmem:[#allocation11 + $0x658] sm:$0xff] }
 0x316   :  { %v1996_v43 = vpack.c.bf16 %v999_v41, %v997_v40  ;;  %v1355_v40 = vld [vmem:[#allocation13 + $0x28] sm:$0xff]  ;;  %v1027_v41 = vld [vmem:[#allocation11 + $0x738] sm:$0xff] }
 0x317   :  { %1931 = vmatpush1.bf16.msra.mxu0 %v1930_v48  ;;  %v969_v48 = vld [vmem:[#allocation11 + $0x568] sm:$0xff] }
 0x318   :  { %1933 = vmatprep.subr.bf16.mxu0 %v1932_v49  ;;  %v971_v49 = vld [vmem:[#allocation11 + $0x578] sm:$0xff] }
 0x319   :  { %v1968_v61 = vpack.c.bf16 %v971_v49, %v969_v48  ;;  %v1000_v49 = vld [vmem:[#allocation11 + $0x660] sm:$0xff] }
 0x31b   :  { %1935 = vmatpush1.bf16.msra.mxu0 %v1934_v53  ;;  %v973_v53 = vld [vmem:[#allocation11 + $0x588] sm:$0xff] }
 0x31c   :  { %1937 = vmatprep.subr.bf16.mxu0 %v1936_v55  ;;  %v975_v55 = vld [vmem:[#allocation11 + $0x598] sm:$0xff] }
 0x31d   :  { %v1972_v57 = vpack.c.bf16 %v975_v55, %v973_v53  ;;  %v1004_v55 = vld [vmem:[#allocation11 + $0x680] sm:$0xff] }
 0x31f   :  { %1939 = vmatpush1.bf16.msra.mxu0 %v1938_v60  ;;  %v977_v60 = vld [vmem:[#allocation11 + $0x5a8] sm:$0xff] }
 0x320   :  { %1941 = vmatprep.subr.bf16.mxu0 %v1940_v62  ;;  %v979_v62 = vld [vmem:[#allocation11 + $0x5b8] sm:$0xff] }
 0x321   :  { %v1976_v0 = vpack.c.bf16 %v979_v62, %v977_v60  ;;  %v1008_v62 = vld [vmem:[#allocation11 + $0x6a0] sm:$0xff] }
 0x323   :  { %1943 = vmatpush1.bf16.msra.mxu0 %v1942_v4  ;;  %v981_v4 = vld [vmem:[#allocation11 + $0x5c8] sm:$0xff] }
 0x324   :  { %1945 = vmatprep.subr.bf16.mxu0 %v1944_v5  ;;  %v983_v5 = vld [vmem:[#allocation11 + $0x5d8] sm:$0xff] }
 0x325   :  { %v1980_v42 = vpack.c.bf16 %v983_v5, %v981_v4  ;;  %v1012_v5 = vld [vmem:[#allocation11 + $0x6c0] sm:$0xff] }
 0x327   :  { %1947 = vmatpush1.bf16.msra.mxu0 %v1946_v8  ;;  %v982_v8 = vld [vmem:[#allocation11 + $0x5d0] sm:$0xff] }
 0x328   :  { %1949 = vmatprep.subr.bf16.mxu0 %v1948_v9  ;;  %v494_v9 = vsub.s32 7, %v2520_v16  ;;  %v1982_v12 = vpack.c.bf16 %v982_v8, %v980_v7  ;;  %v1016_v7 = vld [vmem:[#allocation11 + $0x6e0] sm:$0xff]  ;;  %v1018_v8 = vld [vmem:[#allocation11 + $0x6f0] sm:$0xff] }
 0x32a   :  { %v495_v21 = vrot.slane %v2527_v19, %v494_v9 }
 0x32b   :  { %v2541_v26 = vpop.f32.mrb[2].mxu0  ;;  %v2543_v27 = vpop.f32.mrb[6].mxu1  ;;  %1951 = vmatpush1.bf16.msra.mxu0 %v1950_v15  ;;  %v984_v15 = vld [vmem:[#allocation11 + $0x5e0] sm:$0xff] }
 0x32c   :  { %v714_v29 = vpop.f32.mrb[3].mxu0  ;;  %v2545_v1 = vpop.f32.mrb[7].mxu1  ;;  %1953 = vmatprep.subr.bf16.mxu0 %v1952_v18  ;;  %v986_v18 = vld [vmem:[#allocation11 + $0x5f0] sm:$0xff]  ;;  %v713_v25 = vadd.f32 %v2541_v26, %v483_v13  ;;  %v1367_v13 = vld [vmem:[#allocation13 + $0x88] sm:$0xff] }
 0x32d   :  { %v715_v33 = vadd.f32 %v714_v29, %v487_v23  ;;  %v991_v23 = vld [vmem:[#allocation11 + $0x618] sm:$0xff]  ;;  %v1986_v24 = vpack.c.bf16 %v986_v18, %v984_v15  ;;  %v988_v29 = vld [vmem:[#allocation11 + $0x600] sm:$0xff]  ;;  %v786_v31 = vadd.f32 %v2545_v1, %v495_v21  ;;  %v998_v1 = vld [vmem:[#allocation11 + $0x650] sm:$0xff] }
 0x32e   :  { %v792_v35 = vmax.f32 %v713_v25, 0.0  ;;  %v1351_v21 = vld [vmem:[#allocation13 + $0x8] sm:$0xff] }
 0x32f   :  { %v793_v36 = vmax.f32 %v715_v33, 0.0  ;;  %1955 = vmatpush1.bf16.msra.mxu0 %v1954_v28  ;;  %v1988_v28 = vpack.c.bf16 %v991_v23, %v989_v22  ;;  %v995_v33 = vld [vmem:[#allocation11 + $0x638] sm:$0xff]  ;;  %v795_v39 = vmax.f32 %v786_v31, 0.0  ;;  %v1368_v22 = vld [vmem:[#allocation13 + $0x90] sm:$0xff]  ;;  %v1371_v31 = vld [vmem:[#allocation13 + $0xa8] sm:$0xff] }
 0x330   :  { %1957 = vmatprep.subr.bf16.mxu0 %v1956_v30  ;;  %v990_v30 = vld [vmem:[#allocation11 + $0x610] sm:$0xff]  ;;  %v1369_v23 = vld [vmem:[#allocation13 + $0x98] sm:$0xff] }
 0x331   :  { %1270 = vmatprep.mubr.f32.mxu0 %v793_v36  ;;  %v1990_v34 = vpack.c.bf16 %v990_v30, %v988_v29  ;;  %v1992_v36 = vpack.c.bf16 %v995_v33, %v993_v32  ;;  %v2056_v25 = vpack.c.bf16 %v1369_v23, %v1368_v22  ;;  %v1353_v29 = vld [vmem:[#allocation13 + $0x18] sm:$0xff]  ;;  %v1370_v30 = vld [vmem:[#allocation13 + $0xa0] sm:$0xff]  ;;  %v2018_v32 = vpack.c.bf16 %v1018_v8, %v1016_v7  ;;  %v1037_v8 = vld [vmem:[#allocation11 + $0x788] sm:$0xff] }
 0x332   :  { %v1020_v33 = vld [vmem:[#allocation11 + $0x700] sm:$0xff]  ;;  %v1038_v23 = vld [vmem:[#allocation11 + $0x790] sm:$0xff] }
 0x333   :  { %1959 = vmatpush1.bf16.msra.mxu0 %v1958_v37  ;;  %v992_v37 = vld [vmem:[#allocation11 + $0x620] sm:$0xff] }
 0x334   :  { %1961 = vmatprep.subr.bf16.mxu0 %v1960_v38  ;;  %v994_v38 = vld [vmem:[#allocation11 + $0x630] sm:$0xff]  ;;  %v1036_v22 = vld [vmem:[#allocation11 + $0x780] sm:$0xff] }
 0x335   :  { %v1994_v26 = vpack.c.bf16 %v994_v38, %v992_v37  ;;  %v1025_v37 = vld [vmem:[#allocation11 + $0x728] sm:$0xff]  ;;  %v2060_v38 = vpack.c.bf16 %v1371_v31, %v1370_v30  ;;  %v1040_v31 = vld [vmem:[#allocation11 + $0x7a0] sm:$0xff] }
 0x337   :  { %1963 = vmatpush1.bf16.msra.mxu0 %v1962_v44  ;;  %v996_v44 = vld [vmem:[#allocation11 + $0x640] sm:$0xff] }
 0x338   :  { %1965 = vmatprep.subr.bf16.mxu0 %v1964_v45  ;;  %v1001_v45 = vld [vmem:[#allocation11 + $0x668] sm:$0xff]  ;;  %v1998_v47 = vpack.c.bf16 %v998_v1, %v996_v44  ;;  %v1024_v1 = vld [vmem:[#allocation11 + $0x720] sm:$0xff] }
 0x339   :  { %v2000_v48 = vpack.c.bf16 %v1003_v46, %v1001_v45  ;;  %v1026_v45 = vld [vmem:[#allocation11 + $0x730] sm:$0xff] }
 0x33b   :  { %1967 = vmatpush1.bf16.msra.mxu0 %v1966_v50  ;;  %v1002_v50 = vld [vmem:[#allocation11 + $0x670] sm:$0xff] }
 0x33c   :  { %1969 = vmatprep.subr.bf16.mxu0 %v1968_v61  ;;  %v1005_v61 = vld [vmem:[#allocation11 + $0x688] sm:$0xff]  ;;  %v2002_v52 = vpack.c.bf16 %v1002_v50, %v1000_v49  ;;  %v1356_v50 = vld [vmem:[#allocation13 + $0x30] sm:$0xff] }
 0x33d   :  { %v2004_v53 = vpack.c.bf16 %v1007_v51, %v1005_v61  ;;  %v1357_v61 = vld [vmem:[#allocation13 + $0x38] sm:$0xff] }
 0x33e   :  { %v1031_v51 = vld [vmem:[#allocation11 + $0x758] sm:$0xff] }
 0x33f   :  { %1971 = vmatpush1.bf16.msra.mxu0 %v1970_v56  ;;  %v1006_v56 = vld [vmem:[#allocation11 + $0x690] sm:$0xff] }
 0x340   :  { %1973 = vmatprep.subr.bf16.mxu0 %v1972_v57  ;;  %v1009_v57 = vld [vmem:[#allocation11 + $0x6a8] sm:$0xff]  ;;  %v2006_v59 = vpack.c.bf16 %v1006_v56, %v1004_v55  ;;  %v2026_v55 = vpack.c.bf16 %v1026_v45, %v1024_v1  ;;  %v1028_v56 = vld [vmem:[#allocation11 + $0x740] sm:$0xff]  ;;  %v1050_v45 = vld [vmem:[#allocation11 + $0x7f0] sm:$0xff] }
 0x341   :  { %v2008_v60 = vpack.c.bf16 %v1011_v58, %v1009_v57  ;;  %v1030_v57 = vld [vmem:[#allocation11 + $0x750] sm:$0xff]  ;;  %v2066_v58 = vpack.c.bf16 %v1357_v61, %v1356_v50  ;;  %v1048_v1 = vld [vmem:[#allocation11 + $0x7e0] sm:$0xff]  ;;  %v1363_v50 = vld [vmem:[#allocation13 + $0x68] sm:$0xff] }
 0x343   :  { %1975 = vmatpush1.bf16.msra.mxu0 %v1974_v63  ;;  %v1010_v63 = vld [vmem:[#allocation11 + $0x6b0] sm:$0xff] }
 0x344   :  { %1977 = vmatprep.subr.bf16.mxu0 %v1976_v0  ;;  %v1013_v0 = vld [vmem:[#allocation11 + $0x6c8] sm:$0xff]  ;;  %v2010_v3 = vpack.c.bf16 %v1010_v63, %v1008_v62  ;;  %v1358_v63 = vld [vmem:[#allocation13 + $0x40] sm:$0xff] }
 0x345   :  { %v2012_v4 = vpack.c.bf16 %v1015_v2, %v1013_v0  ;;  %v1359_v0 = vld [vmem:[#allocation13 + $0x48] sm:$0xff]  ;;  %v1035_v2 = vld [vmem:[#allocation11 + $0x778] sm:$0xff] }
 0x347   :  { %1979 = vmatpush1.bf16.msra.mxu0 %v1978_v6  ;;  %v1014_v6 = vld [vmem:[#allocation11 + $0x6d0] sm:$0xff] }
 0x348   :  { %1981 = vmatprep.subr.bf16.mxu0 %v1980_v42  ;;  %v1019_v42 = vld [vmem:[#allocation11 + $0x6f8] sm:$0xff]  ;;  %v2014_v9 = vpack.c.bf16 %v1014_v6, %v1012_v5  ;;  %v2030_v5 = vpack.c.bf16 %v1030_v57, %v1028_v56  ;;  %v1032_v6 = vld [vmem:[#allocation11 + $0x760] sm:$0xff]  ;;  %v1364_v56 = vld [vmem:[#allocation13 + $0x70] sm:$0xff] }
 0x349   :  { %v2016_v15 = vpack.c.bf16 %v1019_v42, %v1017_v54  ;;  %v1034_v54 = vld [vmem:[#allocation11 + $0x770] sm:$0xff]  ;;  %v2070_v42 = vpack.c.bf16 %v1359_v0, %v1358_v63  ;;  %v1365_v57 = vld [vmem:[#allocation13 + $0x78] sm:$0xff] }
 0x34b   :  { %1983 = vmatpush1.bf16.msra.mxu0 %v1982_v12  ;;  %v1366_v12 = vld [vmem:[#allocation13 + $0x80] sm:$0xff] }
 0x34c   :  { %1985 = vmatprep.subr.bf16.mxu0 %v1984_v14  ;;  %v1350_v14 = vld [vmem:[#allocation13] sm:$0xff]  ;;  %v2052_v18 = vpack.c.bf16 %v1367_v13, %v1366_v12  ;;  %v1039_v12 = vld [vmem:[#allocation11 + $0x798] sm:$0xff] }
 0x34d   :  { %v1378_v13 = vld [vmem:[#allocation13 + $0xe0] sm:$0xff] }
 0x34e   :  { %2053 = vmatprep.subr.bf16.mxu1 %v2052_v18 }
 0x34f   :  { %1987 = vmatpush1.bf16.msra.mxu0 %v1986_v24  ;;  %v2054_v24 = vpack.c.bf16 %v1351_v21, %v1350_v14  ;;  %v1379_v14 = vld [vmem:[#allocation13 + $0xe8] sm:$0xff]  ;;  %v2036_v21 = vpack.c.bf16 %v1039_v12, %v1037_v8 }
 0x350   :  { %1989 = vmatprep.subr.bf16.mxu0 %v1988_v28  ;;  %v1352_v28 = vld [vmem:[#allocation13 + $0x10] sm:$0xff] }
 0x351   :  { %2055 = vmatpush3.bf16.msra.mxu1 %v2054_v24  ;;  %v2076_v24 = vpack.c.bf16 %v1379_v14, %v1378_v13 }
 0x352   :  { %1271 = vmatmul.mubr.f32.vlgmr.msra.gmra.mrb[4].mxu0 %v792_v35  ;;  %v2058_v35 = vpack.c.bf16 %v1353_v29, %v1352_v28  ;;  %2057 = vmatprep.subr.bf16.mxu1 %v2056_v25  ;;  %v1041_v25 = vld [vmem:[#allocation11 + $0x7a8] sm:$0xff]  ;;  %v1043_v28 = vld [vmem:[#allocation11 + $0x7b8] sm:$0xff]  ;;  %v2038_v29 = vpack.c.bf16 %v1038_v23, %v1036_v22 }
 0x353   :  { %1991 = vmatpush1.bf16.msra.mxu0 %v1990_v34  ;;  %1341 = vmatprep.mubr.f32.mxu0 %v795_v39  ;;  %v1022_v34 = vld [vmem:[#allocation11 + $0x710] sm:$0xff]  ;;  %v1354_v39 = vld [vmem:[#allocation13 + $0x20] sm:$0xff]  ;;  %v2040_v30 = vpack.c.bf16 %v1043_v28, %v1041_v25 }
 0x354   :  { %1993 = vmatprep.subr.bf16.mxu0 %v1992_v36  ;;  %v2020_v36 = vpack.c.bf16 %v1023_v11, %v1021_v10  ;;  %v2022_v44 = vpack.c.bf16 %v1022_v34, %v1020_v33  ;;  %v2062_v46 = vpack.c.bf16 %v1355_v40, %v1354_v39  ;;  %v1360_v10 = vld [vmem:[#allocation13 + $0x50] sm:$0xff]  ;;  %v1361_v11 = vld [vmem:[#allocation13 + $0x58] sm:$0xff]  ;;  %v1045_v33 = vld [vmem:[#allocation11 + $0x7c8] sm:$0xff] }
 0x355   :  { %2059 = vmatpush3.bf16.msra.mxu1 %v2058_v35  ;;  %v2074_v18 = vpack.c.bf16 %v1361_v11, %v1360_v10  ;;  %v1047_v34 = vld [vmem:[#allocation11 + $0x7d8] sm:$0xff]  ;;  %v1046_v39 = vld [vmem:[#allocation11 + $0x7d0] sm:$0xff]  ;;  %v1049_v40 = vld [vmem:[#allocation11 + $0x7e8] sm:$0xff] }
 0x356   :  { %2061 = vmatprep.subr.bf16.mxu1 %v2060_v38  ;;  %v1044_v38 = vld [vmem:[#allocation11 + $0x7c0] sm:$0xff] }
 0x357   :  { %1995 = vmatpush1.bf16.msra.mxu0 %v1994_v26  ;;  %v1372_v26 = vld [vmem:[#allocation13 + $0xb0] sm:$0xff] }
 0x358   :  { %1997 = vmatprep.subr.bf16.mxu0 %v1996_v43  ;;  %v1373_v43 = vld [vmem:[#allocation13 + $0xb8] sm:$0xff] }
 0x359   :  { %v2064_v49 = vpack.c.bf16 %v1373_v43, %v1372_v26  ;;  %2063 = vmatpush3.bf16.msra.mxu1 %v2062_v46  ;;  %v2046_v26 = vpack.c.bf16 %v1046_v39, %v1044_v38  ;;  %v2050_v46 = vpack.c.bf16 %v1050_v45, %v1048_v1 }
 0x35b   :  { %1999 = vmatpush1.bf16.msra.mxu0 %v1998_v47  ;;  %v2024_v47 = vpack.c.bf16 %v1027_v41, %v1025_v37  ;;  %2065 = vmatprep.subr.bf16.mxu1 %v2064_v49  ;;  %v2044_v37 = vpack.c.bf16 %v1047_v34, %v1045_v33  ;;  %v1051_v41 = vld [vmem:[#allocation11 + $0x7f8] sm:$0xff]  ;;  %v1362_v49 = vld [vmem:[#allocation13 + $0x60] sm:$0xff] }
 0x35c   :  { %2001 = vmatprep.subr.bf16.mxu0 %v2000_v48  ;;  %v1029_v48 = vld [vmem:[#allocation11 + $0x748] sm:$0xff]  ;;  %v2078_v61 = vpack.c.bf16 %v1363_v50, %v1362_v49 }
 0x35d   :  { %2067 = vmatpush3.bf16.msra.mxu1 %v2066_v58  ;;  %v2082_v58 = vpack.c.bf16 %v1365_v57, %v1364_v56 }
 0x35f   :  { %2003 = vmatpush1.bf16.msra.mxu0 %v2002_v52  ;;  %v1374_v52 = vld [vmem:[#allocation13 + $0xc0] sm:$0xff] }
 0x360   :  { %2005 = vmatprep.subr.bf16.mxu0 %v2004_v53  ;;  %v1375_v53 = vld [vmem:[#allocation13 + $0xc8] sm:$0xff] }
 0x361   :  { %v2068_v62 = vpack.c.bf16 %v1375_v53, %v1374_v52  ;;  %v1380_v52 = vld [vmem:[#allocation13 + $0xf0] sm:$0xff]  ;;  %v1381_v53 = vld [vmem:[#allocation13 + $0xf8] sm:$0xff] }
 0x363   :  { %2007 = vmatpush1.bf16.msra.mxu0 %v2006_v59  ;;  %v2028_v59 = vpack.c.bf16 %v1031_v51, %v1029_v48  ;;  %2069 = vmatprep.subr.bf16.mxu1 %v2068_v62 }
 0x364   :  { %2009 = vmatprep.subr.bf16.mxu0 %v2008_v60  ;;  %v1033_v60 = vld [vmem:[#allocation11 + $0x768] sm:$0xff]  ;;  %2071 = vmatpush3.bf16.msra.mxu1 %v2070_v42  ;;  %v1480_v42 = vld [vmem:[%s2589_s11] ss:$0 sm:$0xff] }
 0x365   :  { %v2032_v7 = vpack.c.bf16 %v1035_v2, %v1033_v60 }
 0x367   :  { %2011 = vmatpush1.bf16.msra.mxu0 %v2010_v3  ;;  %v1376_v3 = vld [vmem:[#allocation13 + $0xd0] sm:$0xff] }
 0x368   :  { %2013 = vmatprep.subr.bf16.mxu0 %v2012_v4  ;;  %v1377_v4 = vld [vmem:[#allocation13 + $0xd8] sm:$0xff] }
 0x36b   :  { %2015 = vmatpush1.bf16.msra.mxu0 %v2014_v9  ;;  %v2072_v9 = vpack.c.bf16 %v1377_v4, %v1376_v3 }
 0x36c   :  { %2017 = vmatprep.subr.bf16.mxu0 %v2016_v15  ;;  %v2034_v15 = vpack.c.bf16 %v1034_v54, %v1032_v6 }
 0x36d   :  { %2073 = vmatprep.subr.bf16.mxu1 %v2072_v9 }
 0x36e   :  { %2075 = vmatpush3.bf16.msra.mxu1 %v2074_v18 }
 0x36f   :  { %2019 = vmatpush1.bf16.msra.mxu0 %v2018_v32  ;;  %v1042_v32 = vld [vmem:[#allocation11 + $0x7b0] sm:$0xff]  ;;  %2077 = vmatprep.subr.bf16.mxu1 %v2076_v24 }
 0x370   :  { %2021 = vmatprep.subr.bf16.mxu0 %v2020_v36  ;;  %v2042_v35 = vpack.c.bf16 %v1042_v32, %v1040_v31  ;;  %v490_v36 = vsub.s32 6, %v2520_v16 }
 0x372   :  { %v491_v43 = vrot.slane %v2527_v19, %v490_v36  ;;  %2079 = vmatpush3.bf16.msra.mxu1 %v2078_v61 }
 0x373   :  { %2023 = vmatpush1.bf16.msra.mxu0 %v2022_v44  ;;  %v2048_v44 = vpack.c.bf16 %v1051_v41, %v1049_v40 }
 0x374   :  { %2025 = vmatprep.subr.bf16.mxu0 %v2024_v47  ;;  %v784_v47 = vadd.f32 %v2543_v27, %v491_v43  ;;  %v1052_v27 = vld [vmem:[%s2587_s9] sm:$0x3]  ;;  %s2315_s9 = smov [#allocation14]  }
 0x375   :  { %v1061_v60 = vrot.slane %v1052_v27, %v470_v20  ;;  %s1466_s20 = sshll.u32 %s2315_s9, 4  ;;  %s1467_s20 = int_to_ptr.vmem [resolvable:$true] %s1466_s20 }
 0x376   :  { %v794_v48 = vmax.f32 %v784_v47, 0.0  ;;  %s2267_s21 = scalar_lea.vmem %s1467_s20, 128  ;;  %p2272_p1 = scmp.lt.s32.totalorder %s1467_s20, %s1467_s20 }
 0x377   :  { %2027 = vmatpush1.bf16.msra.mxu0 %v2026_v55  ;;  %v2080_v55 = vpack.c.bf16 %v1381_v53, %v1380_v52  ;;  %p2268_p0 = scmp.ne.s32.totalorder %s1467_s20, %s2267_s21  ;;  %p2273_p2 = scmp.lt.s32.totalorder %s2267_s21, %s2267_s21 }
 0x378   :  { %2029 = vmatprep.subr.bf16.mxu0 %v2028_v59  ;;  %v1057_v59 = vrot.slane %v1052_v27, %v466_v17 }
 0x379   :  { %2081 = vmatprep.subr.bf16.mxu1 %v2080_v55  ;;  %p2274_p3 = por %p2273_p2, %p2272_p1 }
 0x37a   :  { %2083 = vmatpush3.bf16.msra.mxu1 %v2082_v58 }
 0x37b   :  { %2031 = vmatpush1.bf16.msra.mxu0 %v2030_v5  ;;  %p2275_p4 = pnand %p2274_p3, %p2268_p0 }
 0x37c   :  { %2033 = vmatprep.subr.bf16.mxu0 %v2032_v7 }
 0x37f   :  { %2035 = vmatpush1.bf16.msra.mxu0 %v2034_v15 }
 0x380   :  { %2037 = vmatprep.subr.bf16.mxu0 %v2036_v21 }
 0x383   :  { %2039 = vmatpush1.bf16.msra.mxu0 %v2038_v29 }
 0x384   :  { %2041 = vmatprep.subr.bf16.mxu0 %v2040_v30 }
 0x387   :  { %2043 = vmatpush1.bf16.msra.mxu0 %v2042_v35 }
 0x388   :  { %2045 = vmatprep.subr.bf16.mxu0 %v2044_v37 }
 0x38b   :  { %2047 = vmatpush1.bf16.msra.mxu0 %v2046_v26 }
 0x38c   :  { %2049 = vmatprep.subr.bf16.mxu0 %v2048_v44 }
 0x38f   :  { %2051 = vmatpush1.bf16.msra.mxu0 %v2050_v46 }
 0x392   :  { %1342 = vmatmul.mubr.f32.vlgmr.msra.gmra.mrb[4].mxu0 %v794_v48 }
 0x3e5   :  { %v1130_v51 = vpop.f32.mrb[8].mxu1 }
 0x3e6   :  { %v1132_v19 = vpop.f32.mrb[9].mxu1  ;;  %v1131_v62 = vadd.f32 %v1130_v51, %v1057_v59 }
 0x3e7   :  { %v1133_v63 = vadd.f32 %v1132_v19, %v1061_v60 }
 0x465   :  { %v1343_v0 = vpop.f32.mrb[4].mxu0 }
 0x466   :  { %v2085_v2 = vadd.f32 %v1343_v0, %v1131_v62  ;;  %v1345_v3 = vpop.f32.mrb[5].mxu0 }
 0x467   :  { %v2087_v4 = vadd.f32 %v1345_v3, %v1133_v63 }
 0x468   :  { %v1348_v6 = vmax.f32 %v2085_v2, 0.0 }
 0x469   :  { %v1349_v5 = vmax.f32 %v2087_v4, 0.0 }
 0x46b   :  { %1453 = vmatprep.mubr.f32.mxu1 %v1349_v5 }
 0x46c   :  { %1454 = vmatmul.mubr.f32.vlgmr.msra.gmra.mrb[10].mxu1 %v1348_v6 }
 0x53f   :  { %v1547_v54 = vpop.f32.mrb[10].mxu1 }
 0x540   :  { %v1548_v7 = vpop.f32.mrb[11].mxu1 }
 0x541   :  { %v1549_v16 = vadd.f32 %v1548_v7, %v1547_v54 }
 0x543   :  { %v1456_v17 = vadd.f32 %v1549_v16, %v1480_v42 }
 0x545   :  { %1459 = vst [vmem:[#allocation14] sm:$0xff] %v1456_v17 }
 0x546   :  { %2278 = shalt.err (!%p2275_p4)
}
 0x547   :  { %s2279_s4 = scalar_lea.hbm %s2590_s12, 128 }
 0x548   :  { %p2280_p5 = scmp.ne.s32.totalorder %s2590_s12, %s2279_s4  ;;  %p2283_p6 = scmp.lt.u32.totalorder %s2279_s4, %s2590_s12 }
 0x54a   :  { %p2285_p7 = pnand %p2283_p6, %p2280_p5 }
 0x54c   :  { %2288 = shalt.err (!%p2285_p7)
}
 0x54d   :  { %1469 = dma.vmem_to_hbm [thread:$0]  %s1467_s20, 128, %s2590_s12, [#allocation4]  }
 0x54e   :  { %2297 = dma.done.wait [#allocation4], 128  }
 0x54f   :  { %2298 = vsyncadd [#allocation4], 4294967168 }
 0x550   :  { %1473 = vsyncpa [#allocation3], 1 }
 0x551   :  { %1474 = vsyncpa [#allocation6], 1 }
 0x552   :  { %1475 = vsyncpa [#allocation9], 1 }
 0x553   :  { %1476 = vsyncpa [#allocation12], 1 }
 0x554   :  { %1477 = vsyncpa [#allocation4], 1 }

</bundles_post_ra>
